<compile_context>
chip_gen: v5e
topology: v5e:2x2
jax: 0.10.0
libtpu: 0.0.40
codegen_flags: <defaults>
</compile_context>

<pallas_src>
import math

import jax
import jax.numpy as jnp
from jax import lax
from jax.experimental import pallas as pl
from jax.experimental.pallas import tpu as pltpu

VMEM_LIMIT = 8 * 1024 * 1024   # ~2 MiB actual demand; modest, safe on v5e/v6e/v7x


# ----------------------------------------------------------------------------
# Fused kernel: q/k/v Linear projections + single-head outer-product attention.
# ----------------------------------------------------------------------------
def _attention_model_kernel(q_ref, k_ref, v_ref, w_ref, b_ref, o_ref):
    B, D = q_ref.shape

    # --- all three projections in ONE MXU matmul (bf16 operands, f32 accum) ---
    #   X = [q; k; v] (3B, D)  @  W = [Wq_s^T | Wk^T | Wv^T] (D, 3D)  +  b (1, 3D)
    # Only the three diagonal (B, D) blocks of the (3B, 3D) result are used;
    # the wasted FLOPs are irrelevant at this size.
    x = jnp.concatenate([q_ref[...], k_ref[...], v_ref[...]], axis=0)
    y = jnp.dot(x.astype(w_ref.dtype), w_ref[...],
                preferred_element_type=jnp.float32) + b_ref[...]
    qp = y[0 * B:1 * B, 0 * D:1 * D]        # (B, D), 1/sqrt(D) already folded in
    kp = y[1 * B:2 * B, 1 * D:2 * D]        # (B, D)
    vp = y[2 * B:3 * B, 2 * D:3 * D]        # (B, D)

    # q' must sit along sublanes (it indexes the softmax rows).  One tiny in-kernel
    # (B, D) -> (D, B) transpose replaces the old host-side q.T + (D,B)/(D,1) inputs.
    qpT = jnp.transpose(qp)                 # (D, B)

    ones_row = jnp.ones((1, D), jnp.float32)
    rows = []
    for b in range(B):                      # B is tiny and static -> unrolled
        qcol = qpT[:, b:b + 1]              # (D, 1)   (scaled q projection)
        krow = kp[b:b + 1, :]               # (1, D)
        vrow = vp[b:b + 1, :]               # (1, D)

        # Exact row-max of the rank-1 score matrix without a (D, D) XLU reduce:
        #   max_j q_i*k_j == q_i*kmax if q_i > 0 else q_i*kmin   (bit-identical).
        kmax = jnp.max(krow, axis=-1, keepdims=True)     # (1, 1)
        kmin = jnp.min(krow, axis=-1, keepdims=True)     # (1, 1)
        m = jnp.where(qcol > 0, qcol * kmax, qcol * kmin)  # (D, 1)

        # Unnormalized, numerically-stable softmax weights.  m does not depend on
        # the materialized scores, so this fuses vreg-by-vreg (only e stays live).
        e = jnp.exp(qcol * krow - m)        # (D, D)

        # Numerator and denominator in ONE MXU matmul (shared RHS e):
        #   nd[0, i] = sum_j v_j * e[i, j]      (unnormalized attention output)
        #   nd[1, i] = sum_j       e[i, j]      (softmax denominator, >= 1)
        lhs = jnp.concatenate([vrow, ones_row], axis=0)      # (2, D)
        nd = lax.dot_general(lhs, e,
                             dimension_numbers=(((1,), (1,)), ((), ())),
                             preferred_element_type=jnp.float32)  # (2, D)

        # den >= 1 (the row max contributes exp(0) = 1) -> approx reciprocal is safe.
        rows.append(nd[0:1, :] * pl.reciprocal(nd[1:2, :], approx=True))

    # Single (B, D) store instead of B masked row stores.
    o_ref[...] = jnp.concatenate(rows, axis=0)


def attention_model_forward(q, k, v, p):
    """AttentionModel.forward(q, k, v) with head_num == 1 (eval mode)."""
    B, D = q.shape

    def full(shape):
        return pl.BlockSpec(shape, lambda i: (0, 0))

    return pl.pallas_call(
        _attention_model_kernel,
        out_shape=jax.ShapeDtypeStruct((B, D), jnp.float32),
        grid=(1,),
        in_specs=[full((B, D)), full((B, D)), full((B, D)),
                  full((D, 3 * D)), full((1, 3 * D))],
        out_specs=full((B, D)),
        compiler_params=pltpu.CompilerParams(
            dimension_semantics=("arbitrary",),
            vmem_limit_bytes=VMEM_LIMIT),
    )(q, k, v, p["w_all"], p["b_all"])


# ----------------------------------------------------------------------------
# Deterministic parameter construction (synthetic, PyTorch-like uniform init).
# ----------------------------------------------------------------------------
def init_params(key, input_shape):
    D = input_shape
    bound = 1.0 / math.sqrt(D)
    ks = jax.random.split(key, 6)

    def u(k, shape):
        return jax.random.uniform(k, shape, jnp.float32, -bound, bound)

    wq = u(ks[0], (D, D))   # torch nn.Linear layout: (out, in)
    bq = u(ks[1], (D,))
    wk = u(ks[2], (D, D))
    bk = u(ks[3], (D,))
    wv = u(ks[4], (D, D))
    bv = u(ks[5], (D,))

    scale = 1.0 / math.sqrt(D)   # D = 256 -> power of two -> exact fold, no rounding
    # Fused projection operands consumed by the kernel:
    #   RHS  = [ (Wq*scale)^T | Wk^T | Wv^T ]  (in, 3*out)  in bf16 (halves weight DMA)
    #   bias = [  bq*scale    | bk   | bv   ]  (1, 3*out)   kept in f32
    w_all = jnp.concatenate([(wq * scale).T, wk.T, wv.T], axis=1).astype(jnp.bfloat16)
    b_all = jnp.concatenate([bq * scale, bk, bv]).reshape(1, 3 * D).astype(jnp.float32)

    # TODO(synk): head_num > 1 path (head split + concat_layer) not implemented;
    # with the default head_num == 1, concat_layer is unused in forward.
    return {"w_all": w_all, "b_all": b_all,
            "wq": wq, "bq": bq, "wk": wk, "bk": bk, "wv": wv, "bv": bv}


def reference_forward(q, k, v, p):
    """Pure-JAX reference of the torch forward (head_num == 1), f32 weights."""
    qp = q @ p["wq"].T + p["bq"]
    kp = k @ p["wk"].T + p["bk"]
    vp = v @ p["wv"].T + p["bv"]
    scale = 1.0 / math.sqrt(q.shape[-1])
    scores = qp[:, :, None] * kp[:, None, :] * scale       # (B, D, D)
    attn = jax.nn.softmax(scores, axis=-1)
    return jnp.einsum("bij,bj->bi", attn, vp)


if __name__ == "__main__":
    B = 2
    INPUT_SHAPE = 256   # AttentionModel(input_shape=256, head_num=1)

    key = jax.random.PRNGKey(0)
    pkey, qk, kk, vk = jax.random.split(key, 4)
    params = init_params(pkey, INPUT_SHAPE)
    q = jax.random.normal(qk, (B, INPUT_SHAPE), jnp.float32)
    k = jax.random.normal(kk, (B, INPUT_SHAPE), jnp.float32)
    v = jax.random.normal(vk, (B, INPUT_SHAPE), jnp.float32)

    fwd = jax.jit(attention_model_forward)
    out = jax.block_until_ready(fwd(q, k, v, params))

    assert out.shape == (B, INPUT_SHAPE), out.shape
    assert bool(jnp.all(jnp.isfinite(out)))

    # Loose tolerance: the kernel uses bf16 projection operands (f32 accumulation),
    # the reference runs at XLA's default TPU matmul precision.
    ref = reference_forward(q, k, v, params)
    max_err = float(jnp.max(jnp.abs(out - ref)))
    assert bool(jnp.allclose(out, ref, rtol=5e-2, atol=5e-2)), max_err

    print("KERNEL_OK")
</pallas_src>

<mosaic_0001>
module attributes {stable_mosaic.version = 11 : i64} {
  func.func @_attention_model_kernel(%arg0: i32, %arg1: memref<2x256xf32, #tpu.memory_space<vmem>>, %arg2: memref<2x256xf32, #tpu.memory_space<vmem>>, %arg3: memref<2x256xf32, #tpu.memory_space<vmem>>, %arg4: memref<256x768xbf16, #tpu.memory_space<vmem>>, %arg5: memref<1x768xf32, #tpu.memory_space<vmem>>, %arg6: memref<2x256xf32, #tpu.memory_space<vmem>>) attributes {dimension_semantics = [#tpu.dimension_semantics<arbitrary>], iteration_bounds = array<i64: 1>, scalar_prefetch = 0 : i64, scratch_operands = 0 : i64, tpu.core_type = #tpu.core_type<tc>, window_params = [{pipeline_mode = #tpu.pipeline_mode<synchronous>, transform_indices = @transform_0, window_bounds = array<i64: 2, 256>}, {pipeline_mode = #tpu.pipeline_mode<synchronous>, transform_indices = @transform_1, window_bounds = array<i64: 2, 256>}, {pipeline_mode = #tpu.pipeline_mode<synchronous>, transform_indices = @transform_2, window_bounds = array<i64: 2, 256>}, {pipeline_mode = #tpu.pipeline_mode<synchronous>, transform_indices = @transform_3, window_bounds = array<i64: 256, 768>}, {pipeline_mode = #tpu.pipeline_mode<synchronous>, transform_indices = @transform_4, window_bounds = array<i64: 1, 768>}, {pipeline_mode = #tpu.pipeline_mode<synchronous>, transform_indices = @transform_5, window_bounds = array<i64: 2, 256>}]} {
    %c0 = arith.constant 0 : index
    %c0_0 = arith.constant 0 : index
    %0 = vector.load %arg1[%c0, %c0_0] : memref<2x256xf32, #tpu.memory_space<vmem>>, vector<2x256xf32>
    %c0_1 = arith.constant 0 : index
    %c0_2 = arith.constant 0 : index
    %1 = vector.load %arg2[%c0_1, %c0_2] : memref<2x256xf32, #tpu.memory_space<vmem>>, vector<2x256xf32>
    %c0_3 = arith.constant 0 : index
    %c0_4 = arith.constant 0 : index
    %2 = vector.load %arg3[%c0_3, %c0_4] : memref<2x256xf32, #tpu.memory_space<vmem>>, vector<2x256xf32>
    %3 = tpu.concatenate %0, %1, %2 in 0 : vector<2x256xf32>, vector<2x256xf32>, vector<2x256xf32> -> vector<6x256xf32>
    %4 = arith.truncf %3 : vector<6x256xf32> to vector<6x256xbf16>
    %c0_5 = arith.constant 0 : index
    %c0_6 = arith.constant 0 : index
    %5 = vector.load %arg4[%c0_5, %c0_6] : memref<256x768xbf16, #tpu.memory_space<vmem>>, vector<256x768xbf16>
    %cst = arith.constant dense<0.000000e+00> : vector<6x768xf32>
    %6 = tpu.matmul %4, %5, %cst {dimension_numbers = #tpu.dot_dimension_numbers<[1], [0], [0], [1], [0, 0, 1, 1], [], []>} : vector<6x256xbf16>, vector<256x768xbf16>, vector<6x768xf32> -> vector<6x768xf32>
    %c0_7 = arith.constant 0 : index
    %c0_8 = arith.constant 0 : index
    %7 = vector.load %arg5[%c0_7, %c0_8] : memref<1x768xf32, #tpu.memory_space<vmem>>, vector<1x768xf32>
    %8 = vector.broadcast %7 : vector<1x768xf32> to vector<6x768xf32>
    %9 = arith.addf %6, %8 : vector<6x768xf32>
    %10 = vector.extract_strided_slice %9 {offsets = [0, 0], sizes = [2, 256], strides = [1, 1]} : vector<6x768xf32> to vector<2x256xf32>
    %11 = vector.extract_strided_slice %9 {offsets = [2, 256], sizes = [2, 256], strides = [1, 1]} : vector<6x768xf32> to vector<2x256xf32>
    %12 = vector.extract_strided_slice %9 {offsets = [4, 512], sizes = [2, 256], strides = [1, 1]} : vector<6x768xf32> to vector<2x256xf32>
    %13 = tpu.transpose %10, [1, 0] : vector<2x256xf32> -> vector<256x2xf32>
    %cst_9 = arith.constant 1.000000e+00 : f32
    %14 = vector.broadcast %cst_9 : f32 to vector<1x256xf32>
    %15 = vector.extract_strided_slice %13 {offsets = [0, 0], sizes = [256, 1], strides = [1, 1]} : vector<256x2xf32> to vector<256x1xf32>
    %16 = vector.extract_strided_slice %11 {offsets = [0, 0], sizes = [1, 256], strides = [1, 1]} : vector<2x256xf32> to vector<1x256xf32>
    %17 = vector.extract_strided_slice %12 {offsets = [0, 0], sizes = [1, 256], strides = [1, 1]} : vector<2x256xf32> to vector<1x256xf32>
    %cst_10 = arith.constant dense<0xFF800000> : vector<1xf32>
    %18 = vector.multi_reduction <maximumf>, %16, %cst_10 [1] : vector<1x256xf32> to vector<1xf32>
    %19 = vector.shape_cast %18 : vector<1xf32> to vector<1x1xf32>
    %cst_11 = arith.constant dense<0x7F800000> : vector<1xf32>
    %20 = vector.multi_reduction <minimumf>, %16, %cst_11 [1] : vector<1x256xf32> to vector<1xf32>
    %21 = vector.shape_cast %20 : vector<1xf32> to vector<1x1xf32>
    %cst_12 = arith.constant 0.000000e+00 : f32
    %22 = vector.broadcast %cst_12 : f32 to vector<256x1xf32>
    %23 = arith.cmpf ogt, %15, %22 : vector<256x1xf32>
    %24 = vector.broadcast %19 : vector<1x1xf32> to vector<256x1xf32>
    %25 = arith.mulf %15, %24 : vector<256x1xf32>
    %26 = vector.broadcast %21 : vector<1x1xf32> to vector<256x1xf32>
    %27 = arith.mulf %15, %26 : vector<256x1xf32>
    %28 = arith.select %23, %25, %27 : vector<256x1xi1>, vector<256x1xf32>
    %29 = vector.broadcast %15 : vector<256x1xf32> to vector<256x256xf32>
    %30 = vector.broadcast %16 : vector<1x256xf32> to vector<256x256xf32>
    %31 = arith.mulf %29, %30 : vector<256x256xf32>
    %32 = vector.broadcast %28 : vector<256x1xf32> to vector<256x256xf32>
    %33 = arith.subf %31, %32 : vector<256x256xf32>
    %34 = math.exp %33 : vector<256x256xf32>
    %35 = tpu.concatenate %17, %14 in 0 : vector<1x256xf32>, vector<1x256xf32> -> vector<2x256xf32>
    %cst_13 = arith.constant dense<0.000000e+00> : vector<2x256xf32>
    %36 = tpu.matmul %35, %34, %cst_13 {dimension_numbers = #tpu.dot_dimension_numbers<[1], [1], [0], [0], [0, 0, 1, 0], [], []>} : vector<2x256xf32>, vector<256x256xf32>, vector<2x256xf32> -> vector<2x256xf32>
    %37 = vector.extract_strided_slice %36 {offsets = [0, 0], sizes = [1, 256], strides = [1, 1]} : vector<2x256xf32> to vector<1x256xf32>
    %38 = vector.extract_strided_slice %36 {offsets = [1, 0], sizes = [1, 256], strides = [1, 1]} : vector<2x256xf32> to vector<1x256xf32>
    %39 = tpu.reciprocal %38 {approx = true} : vector<1x256xf32> -> vector<1x256xf32>
    %40 = arith.mulf %37, %39 : vector<1x256xf32>
    %41 = vector.extract_strided_slice %13 {offsets = [0, 1], sizes = [256, 1], strides = [1, 1]} : vector<256x2xf32> to vector<256x1xf32>
    %42 = vector.extract_strided_slice %11 {offsets = [1, 0], sizes = [1, 256], strides = [1, 1]} : vector<2x256xf32> to vector<1x256xf32>
    %43 = vector.extract_strided_slice %12 {offsets = [1, 0], sizes = [1, 256], strides = [1, 1]} : vector<2x256xf32> to vector<1x256xf32>
    %cst_14 = arith.constant dense<0xFF800000> : vector<1xf32>
    %44 = vector.multi_reduction <maximumf>, %42, %cst_14 [1] : vector<1x256xf32> to vector<1xf32>
    %45 = vector.shape_cast %44 : vector<1xf32> to vector<1x1xf32>
    %cst_15 = arith.constant dense<0x7F800000> : vector<1xf32>
    %46 = vector.multi_reduction <minimumf>, %42, %cst_15 [1] : vector<1x256xf32> to vector<1xf32>
    %47 = vector.shape_cast %46 : vector<1xf32> to vector<1x1xf32>
    %cst_16 = arith.constant 0.000000e+00 : f32
    %48 = vector.broadcast %cst_16 : f32 to vector<256x1xf32>
    %49 = arith.cmpf ogt, %41, %48 : vector<256x1xf32>
    %50 = vector.broadcast %45 : vector<1x1xf32> to vector<256x1xf32>
    %51 = arith.mulf %41, %50 : vector<256x1xf32>
    %52 = vector.broadcast %47 : vector<1x1xf32> to vector<256x1xf32>
    %53 = arith.mulf %41, %52 : vector<256x1xf32>
    %54 = arith.select %49, %51, %53 : vector<256x1xi1>, vector<256x1xf32>
    %55 = vector.broadcast %41 : vector<256x1xf32> to vector<256x256xf32>
    %56 = vector.broadcast %42 : vector<1x256xf32> to vector<256x256xf32>
    %57 = arith.mulf %55, %56 : vector<256x256xf32>
    %58 = vector.broadcast %54 : vector<256x1xf32> to vector<256x256xf32>
    %59 = arith.subf %57, %58 : vector<256x256xf32>
    %60 = math.exp %59 : vector<256x256xf32>
    %61 = tpu.concatenate %43, %14 in 0 : vector<1x256xf32>, vector<1x256xf32> -> vector<2x256xf32>
    %cst_17 = arith.constant dense<0.000000e+00> : vector<2x256xf32>
    %62 = tpu.matmul %61, %60, %cst_17 {dimension_numbers = #tpu.dot_dimension_numbers<[1], [1], [0], [0], [0, 0, 1, 0], [], []>} : vector<2x256xf32>, vector<256x256xf32>, vector<2x256xf32> -> vector<2x256xf32>
    %63 = vector.extract_strided_slice %62 {offsets = [0, 0], sizes = [1, 256], strides = [1, 1]} : vector<2x256xf32> to vector<1x256xf32>
    %64 = vector.extract_strided_slice %62 {offsets = [1, 0], sizes = [1, 256], strides = [1, 1]} : vector<2x256xf32> to vector<1x256xf32>
    %65 = tpu.reciprocal %64 {approx = true} : vector<1x256xf32> -> vector<1x256xf32>
    %66 = arith.mulf %63, %65 : vector<1x256xf32>
    %67 = tpu.concatenate %40, %66 in 0 : vector<1x256xf32>, vector<1x256xf32> -> vector<2x256xf32>
    %c0_18 = arith.constant 0 : index
    %c0_19 = arith.constant 0 : index
    %68 = vector.load %arg6[%c0_18, %c0_19] : memref<2x256xf32, #tpu.memory_space<vmem>>, vector<2x256xf32>
    tpu.vector_store %arg6[%c0_18, %c0_19], %67 {strides = array<i32>} : memref<2x256xf32, #tpu.memory_space<vmem>>, vector<2x256xf32>,
    return
  }
  func.func @transform_0(%arg0: i32) -> (i32, i32) {
    %c0_i32 = arith.constant 0 : i32
    %c0_i32_0 = arith.constant 0 : i32
    %c0_i32_1 = arith.constant 0 : i32
    return %c0_i32, %c0_i32_0 : i32, i32
  }
  func.func @transform_1(%arg0: i32) -> (i32, i32) {
    %c0_i32 = arith.constant 0 : i32
    %c0_i32_0 = arith.constant 0 : i32
    %c0_i32_1 = arith.constant 0 : i32
    return %c0_i32, %c0_i32_0 : i32, i32
  }
  func.func @transform_2(%arg0: i32) -> (i32, i32) {
    %c0_i32 = arith.constant 0 : i32
    %c0_i32_0 = arith.constant 0 : i32
    %c0_i32_1 = arith.constant 0 : i32
    return %c0_i32, %c0_i32_0 : i32, i32
  }
  func.func @transform_3(%arg0: i32) -> (i32, i32) {
    %c0_i32 = arith.constant 0 : i32
    %c0_i32_0 = arith.constant 0 : i32
    %c0_i32_1 = arith.constant 0 : i32
    return %c0_i32, %c0_i32_0 : i32, i32
  }
  func.func @transform_4(%arg0: i32) -> (i32, i32) {
    %c0_i32 = arith.constant 0 : i32
    %c0_i32_0 = arith.constant 0 : i32
    %c0_i32_1 = arith.constant 0 : i32
    return %c0_i32, %c0_i32_0 : i32, i32
  }
  func.func @transform_5(%arg0: i32) -> (i32, i32) {
    %c0_i32 = arith.constant 0 : i32
    %c0_i32_0 = arith.constant 0 : i32
    %c0_i32_1 = arith.constant 0 : i32
    return %c0_i32, %c0_i32_0 : i32, i32
  }
}

</mosaic_0001>

<bundles_post_ra>
// kernel: attention_model_forward.1
= control target key start
LH: loop header
LB: loop body
LE: loop exit
PB: predicated region body
PF: predicated region fallthrough
CT: control target
= control target key end

     0   :  { %10 = vsyncpa [#allocation3], 0  ;;  %s4834_s0 = inlined_call_operand.hbm [shape: f32[2,256], index: 0, kind: input, shape index: {}]   ;;  %s4835_s1 = inlined_call_operand.hbm [shape: f32[2,256], index: 1, kind: input, shape index: {}]   ;;  %s4836_s2 = inlined_call_operand.hbm [shape: f32[2,256], index: 2, kind: input, shape index: {}]   ;;  %s4837_s3 = inlined_call_operand.hbm [shape: bf16[256,768], index: 3, kind: input, shape index: {}]   ;;  %s4838_s4 = inlined_call_operand.hbm [shape: f32[1,768], index: 4, kind: input, shape index: {}]   ;;  %s4839_s5 = inlined_call_operand.hbm [shape: f32[2,256], index: 5, kind: output, shape index: {}]  }
   0x1   :  { %11 = vsyncpa [#allocation6], 0 }
   0x2   :  { %12 = vsyncpa [#allocation9], 0  ;;  %s30_s20 = sshll.u32 %s4835_s1, 4  ;;  %s31_s20 = int_to_ptr.hbm [resolvable:$true] %s30_s20 }
   0x3   :  { %13 = vsyncpa [#allocation4], 0  ;;  %s3452_s21 = smov [#allocation5]   ;;  %s51_s25 = sshll.u32 %s4837_s3, 4  ;;  %s52_s25 = int_to_ptr.hbm [resolvable:$true] %s51_s25 }
   0x4   :  { %s32_s22 = sshll.u32 %s3452_s21, 4  ;;  %s3453_s26 = smov [#allocation8]   ;;  %s33_s22 = int_to_ptr.vmem [resolvable:$true] %s32_s22 }
   0x5   :  { %35 = dma.hbm_to_vmem [thread:$0]  %s31_s20, 64, %s33_s22, [#allocation6]  }
   0x6   :  { %s53_s27 = sshll.u32 %s3453_s26, 4  ;;  %s3454_s28 = smov 384   ;;  %s54_s27 = int_to_ptr.vmem [resolvable:$true] %s53_s27 }
   0x7   :  { %s3455_s29 = smov 24   ;;  %s19_s1 = sshll.u32 %s4834_s0, 4  ;;  %s20_s1 = int_to_ptr.hbm [resolvable:$true] %s19_s1 }
   0x8   :  { %59 = dma.hbm_to_vmem [thread:$0]  %s52_s25, 12288, %s54_s27, [#allocation9], %s3454_s28, %s3454_s28, %s3455_s29  }
   0x9   :  { %s3456_s7 = smov [#allocation2]   ;;  %s41_s3 = sshll.u32 %s4836_s2, 4  ;;  %s42_s3 = int_to_ptr.hbm [resolvable:$true] %s41_s3 }
   0xa   :  { %s21_s8 = sshll.u32 %s3456_s7, 4  ;;  %s3457_s11 = smov [#allocation7]   ;;  %s22_s8 = int_to_ptr.vmem [resolvable:$true] %s21_s8 }
   0xb   :  { %24 = dma.hbm_to_vmem [thread:$0]  %s20_s1, 64, %s22_s8, [#allocation3]  }
   0xc   :  { %s43_s12 = sshll.u32 %s3457_s11, 4  ;;  %s65_s15 = sshll.u32 %s4838_s4, 4  ;;  %s44_s12 = int_to_ptr.vmem [resolvable:$true] %s43_s12  ;;  %s66_s15 = int_to_ptr.hbm [resolvable:$true] %s65_s15 }
   0xd   :  { %46 = dma.hbm_to_vmem [thread:$0]  %s42_s3, 64, %s44_s12, [#allocation6]  }
   0xe   :  { %s3458_s0 = smov [#allocation10]  }
   0xf   :  { %s67_s16 = sshll.u32 %s3458_s0, 4  ;;  %s68_s16 = int_to_ptr.vmem [resolvable:$true] %s67_s16 }
  0x10   :  { %70 = dma.hbm_to_vmem [thread:$0]  %s66_s15, 96, %s68_s16, [#allocation9]  }
  0x11   :  { %3444 = dma.done.wait [#allocation3], 64  }
  0x12   :  { %3445 = vsyncadd [#allocation3], 4294967232 }
  0x13   :  { %3446 = dma.done.wait [#allocation6], 128  }
  0x14   :  { %3447 = vsyncadd [#allocation6], 4294967168 }
  0x15   :  { %3448 = dma.done.wait [#allocation9], 12384  }
  0x16   :  { %3449 = vsyncadd [#allocation9], 4294954912  ;;  %v2704_v0 = vld [vmem:[#allocation8 + $0x150] sm:$0xf]  ;;  %v2963_v1 = vld [vmem:[#allocation8 + $0x164] sm:$0xf0] }
  0x17   :  { %v2896_v2 = vld [vmem:[#allocation8 + $0x2d0] sm:$0xf]  ;;  %v2705_v3 = vor.u32 %v2963_v1, %v2704_v0  ;;  %v3011_v4 = vld [vmem:[#allocation8 + $0x2e4] sm:$0xf0]  ;;  %v2960_v5 = vld [vmem:[#allocation8 + $0x154] sm:$0xf] }
  0x18   :  { %v2706_v6 = vld [vmem:[#allocation8 + $0x168] sm:$0xf0]  ;;  %v2897_v7 = vor.u32 %v3011_v4, %v2896_v2  ;;  %v3008_v9 = vld [vmem:[#allocation8 + $0x2d4] sm:$0xf]  ;;  %v2680_v11 = vld [vmem:[#allocation8 + $0x120] sm:$0xf] }
  0x19   :  { %v2709_v8 = vor.u32 %v2960_v5, %v2706_v6  ;;  %v2898_v10 = vld [vmem:[#allocation8 + $0x2e8] sm:$0xf0]  ;;  %712 = vmatpush.bf16.msra.mxu0 %v2705_v3  ;;  %v2957_v13 = vld [vmem:[#allocation8 + $0x134] sm:$0xf0]  ;;  %v2872_v14 = vld [vmem:[#allocation8 + $0x2a0] sm:$0xf] }
  0x1a   :  { %v2901_v12 = vor.u32 %v3008_v9, %v2898_v10  ;;  %v3005_v15 = vld [vmem:[#allocation8 + $0x2b4] sm:$0xf0]  ;;  %725 = vmatpush.bf16.msra.mxu1 %v2897_v7  ;;  %v2681_v16 = vor.u32 %v2957_v13, %v2680_v11  ;;  %v2954_v18 = vld [vmem:[#allocation8 + $0x124] sm:$0xf]  ;;  %v2682_v19 = vld [vmem:[#allocation8 + $0x138] sm:$0xf0] }
  0x1b   :  { %738 = vmatpush.bf16.msra.mxu2 %v2709_v8  ;;  %v2873_v17 = vor.u32 %v3005_v15, %v2872_v14  ;;  %v3002_v20 = vld [vmem:[#allocation8 + $0x2a4] sm:$0xf]  ;;  %v2685_v21 = vor.u32 %v2954_v18, %v2682_v19  ;;  %v2874_v22 = vld [vmem:[#allocation8 + $0x2b8] sm:$0xf0]  ;;  %v2656_v23 = vld [vmem:[#allocation8 + $0xf0] sm:$0xf] }
  0x1c   :  { %751 = vmatpush.bf16.msra.mxu3 %v2901_v12  ;;  %v2951_v24 = vld [vmem:[#allocation8 + $0x104] sm:$0xf0]  ;;  %v2877_v25 = vor.u32 %v3002_v20, %v2874_v22  ;;  %v2848_v26 = vld [vmem:[#allocation8 + $0x270] sm:$0xf]  ;;  %v2948_v28 = vld [vmem:[#allocation8 + $0xf4] sm:$0xf] }
  0x1d   :  { %v2999_v27 = vld [vmem:[#allocation8 + $0x284] sm:$0xf0]  ;;  %713 = vmatpush.bf16.msra.mxu0 %v2681_v16  ;;  %v2657_v29 = vor.u32 %v2951_v24, %v2656_v23  ;;  %v2658_v30 = vld [vmem:[#allocation8 + $0x108] sm:$0xf0]  ;;  %v2996_v31 = vld [vmem:[#allocation8 + $0x274] sm:$0xf] }
  0x1e   :  { %v2850_v32 = vld [vmem:[#allocation8 + $0x288] sm:$0xf0]  ;;  %726 = vmatpush.bf16.msra.mxu1 %v2873_v17  ;;  %v2849_v33 = vor.u32 %v2999_v27, %v2848_v26  ;;  %v2661_v34 = vor.u32 %v2948_v28, %v2658_v30  ;;  %v2632_v35 = vld [vmem:[#allocation8 + $0xc0] sm:$0xf]  ;;  %v2945_v36 = vld [vmem:[#allocation8 + $0xd4] sm:$0xf0] }
  0x1f   :  { %739 = vmatpush.bf16.msra.mxu2 %v2685_v21  ;;  %v2824_v37 = vld [vmem:[#allocation8 + $0x240] sm:$0xf]  ;;  %v2853_v38 = vor.u32 %v2996_v31, %v2850_v32  ;;  %v2993_v39 = vld [vmem:[#allocation8 + $0x254] sm:$0xf0]  ;;  %v2942_v40 = vld [vmem:[#allocation8 + $0xc4] sm:$0xf]  ;;  %v2633_v44 = vor.u32 %v2945_v36, %v2632_v35 }
  0x20   :  { %752 = vmatpush.bf16.msra.mxu3 %v2877_v25  ;;  %v2634_v41 = vld [vmem:[#allocation8 + $0xd8] sm:$0xf0]  ;;  %v2990_v42 = vld [vmem:[#allocation8 + $0x244] sm:$0xf]  ;;  %v2825_v45 = vor.u32 %v2993_v39, %v2824_v37  ;;  %v2608_v47 = vld [vmem:[#allocation8 + $0x90] sm:$0xf] }
  0x21   :  { %v2826_v43 = vld [vmem:[#allocation8 + $0x258] sm:$0xf0]  ;;  %714 = vmatpush.bf16.msra.mxu0 %v2657_v29  ;;  %v2637_v46 = vor.u32 %v2942_v40, %v2634_v41  ;;  %v2939_v48 = vld [vmem:[#allocation8 + $0xa4] sm:$0xf0]  ;;  %v2800_v49 = vld [vmem:[#allocation8 + $0x210] sm:$0xf] }
  0x22   :  { %727 = vmatpush.bf16.msra.mxu1 %v2849_v33  ;;  %v2829_v50 = vor.u32 %v2990_v42, %v2826_v43  ;;  %v2987_v51 = vld [vmem:[#allocation8 + $0x224] sm:$0xf0]  ;;  %v2936_v52 = vld [vmem:[#allocation8 + $0x94] sm:$0xf]  ;;  %v2610_v53 = vld [vmem:[#allocation8 + $0xa8] sm:$0xf0]  ;;  %v2609_v56 = vor.u32 %v2939_v48, %v2608_v47 }
  0x23   :  { %740 = vmatpush.bf16.msra.mxu2 %v2661_v34  ;;  %v2984_v54 = vld [vmem:[#allocation8 + $0x214] sm:$0xf]  ;;  %v2802_v55 = vld [vmem:[#allocation8 + $0x228] sm:$0xf0]  ;;  %v2801_v57 = vor.u32 %v2987_v51, %v2800_v49  ;;  %v2613_v58 = vor.u32 %v2936_v52, %v2610_v53  ;;  %v2584_v59 = vld [vmem:[#allocation8 + $0x60] sm:$0xf] }
  0x24   :  { %753 = vmatpush.bf16.msra.mxu3 %v2853_v38  ;;  %v2933_v60 = vld [vmem:[#allocation8 + $0x74] sm:$0xf0]  ;;  %v2776_v61 = vld [vmem:[#allocation8 + $0x1e0] sm:$0xf]  ;;  %v2805_v62 = vor.u32 %v2984_v54, %v2802_v55  ;;  %v2930_v0 = vld [vmem:[#allocation8 + $0x64] sm:$0xf] }
  0x25   :  { %715 = vmatpush.bf16.msra.mxu0 %v2633_v44  ;;  %v2981_v63 = vld [vmem:[#allocation8 + $0x1f4] sm:$0xf0]  ;;  %v2586_v1 = vld [vmem:[#allocation8 + $0x78] sm:$0xf0]  ;;  %v2978_v2 = vld [vmem:[#allocation8 + $0x1e4] sm:$0xf]  ;;  %v2585_v4 = vor.u32 %v2933_v60, %v2584_v59 }
  0x26   :  { %728 = vmatpush.bf16.msra.mxu1 %v2825_v45  ;;  %v2778_v3 = vld [vmem:[#allocation8 + $0x1f8] sm:$0xf0]  ;;  %v2560_v5 = vld [vmem:[#allocation8 + $0x30] sm:$0xf]  ;;  %v2777_v6 = vor.u32 %v2981_v63, %v2776_v61  ;;  %v2589_v7 = vor.u32 %v2930_v0, %v2586_v1  ;;  %v2927_v8 = vld [vmem:[#allocation8 + $0x44] sm:$0xf0] }
  0x27   :  { %741 = vmatpush.bf16.msra.mxu2 %v2637_v46  ;;  %v2752_v9 = vld [vmem:[#allocation8 + $0x1b0] sm:$0xf]  ;;  %v2975_v10 = vld [vmem:[#allocation8 + $0x1c4] sm:$0xf0]  ;;  %v2781_v11 = vor.u32 %v2978_v2, %v2778_v3  ;;  %v2924_v12 = vld [vmem:[#allocation8 + $0x34] sm:$0xf]  ;;  %v2561_v17 = vor.u32 %v2927_v8, %v2560_v5 }
  0x28   :  { %754 = vmatpush.bf16.msra.mxu3 %v2829_v50  ;;  %v2562_v13 = vld [vmem:[#allocation8 + $0x48] sm:$0xf0]  ;;  %v91_v14 = vld [vmem:[#allocation2] sm:$0xf]  ;;  %v2536_v18 = vld [vmem:[#allocation8] sm:$0xf]  ;;  %v2753_v21 = vor.u32 %v2975_v10, %v2752_v9 }
  0x29   :  { %716 = vmatpush.bf16.msra.mxu0 %v2609_v56  ;;  %v2972_v15 = vld [vmem:[#allocation8 + $0x1b4] sm:$0xf]  ;;  %v2754_v16 = vld [vmem:[#allocation8 + $0x1c8] sm:$0xf0]  ;;  %95 = vst [vmem:[#allocation1] ss:$4 sm:$0xff] %v91_v14  ;;  %v2565_v22 = vor.u32 %v2924_v12, %v2562_v13 }
  0x2a   :  { %729 = vmatpush.bf16.msra.mxu1 %v2801_v57  ;;  %v2921_v19 = vld [vmem:[#allocation8 + $0x14] sm:$0xf0]  ;;  %v2728_v20 = vld [vmem:[#allocation8 + $0x180] sm:$0xf]  ;;  %v2918_v24 = vld [vmem:[#allocation8 + $0x4] sm:$0xf]  ;;  %v2757_v26 = vor.u32 %v2972_v15, %v2754_v16 }
  0x2b   :  { %742 = vmatpush.bf16.msra.mxu2 %v2613_v58  ;;  %v2969_v23 = vld [vmem:[#allocation8 + $0x194] sm:$0xf0]  ;;  %v2538_v25 = vld [vmem:[#allocation8 + $0x18] sm:$0xf0]  ;;  %v2714_v28 = vld [vmem:[#allocation8 + $0x170] sm:$0xf0]  ;;  %v2537_v33 = vor.u32 %v2921_v19, %v2536_v18 }
  0x2c   :  { %755 = vmatpush.bf16.msra.mxu3 %v2805_v62  ;;  %v2961_v27 = vld [vmem:[#allocation8 + $0x15c] sm:$0xf]  ;;  %v92_v29 = vld [vmem:[#allocation5] sm:$0xf]  ;;  %v2966_v30 = vld [vmem:[#allocation8 + $0x184] sm:$0xf]  ;;  %v2729_v37 = vor.u32 %v2969_v23, %v2728_v20  ;;  %v2541_v38 = vor.u32 %v2918_v24, %v2538_v25 }
  0x2d   :  { %717 = vmatpush.bf16.msra.mxu0 %v2585_v4  ;;  %v2730_v31 = vld [vmem:[#allocation8 + $0x198] sm:$0xf0]  ;;  %v2906_v34 = vld [vmem:[#allocation8 + $0x2f0] sm:$0xf0]  ;;  %v2712_v35 = vld [vmem:[#allocation8 + $0x158] sm:$0xf]  ;;  %v2717_v42 = vor.u32 %v2961_v27, %v2714_v28 }
  0x2e   :  { %730 = vmatpush.bf16.msra.mxu1 %v2777_v6  ;;  %v3009_v32 = vld [vmem:[#allocation8 + $0x2dc] sm:$0xf]  ;;  %v2964_v36 = vld [vmem:[#allocation8 + $0x16c] sm:$0xf0]  ;;  %v2955_v39 = vld [vmem:[#allocation8 + $0x12c] sm:$0xf]  ;;  %v2733_v45 = vor.u32 %v2966_v30, %v2730_v31 }
  0x2f   :  { %743 = vmatpush.bf16.msra.mxu2 %v2589_v7  ;;  %v2904_v40 = vld [vmem:[#allocation8 + $0x2d8] sm:$0xf]  ;;  %v3012_v41 = vld [vmem:[#allocation8 + $0x2ec] sm:$0xf0]  ;;  %v2909_v46 = vor.u32 %v3009_v32, %v2906_v34  ;;  %v2690_v47 = vld [vmem:[#allocation8 + $0x140] sm:$0xf0]  ;;  %v2713_v48 = vor.u32 %v2964_v36, %v2712_v35 }
  0x30   :  { %756 = vmatpush.bf16.msra.mxu3 %v2781_v11  ;;  %v3507_v43 = vld.sshfl [vmem:[#allocation1] sm:$0xff pattern:$0x73625140]  ;;  %v3509_v44 = vld.sshfl [vmem:[#allocation1 + $0x8] sm:$0xff pattern:$0x73625140]  ;;  %v2905_v51 = vor.u32 %v3012_v41, %v2904_v40  ;;  %v2693_v57 = vor.u32 %v2955_v39, %v2690_v47 }
  0x31   :  { %718 = vmatpush.bf16.msra.mxu0 %v2561_v17  ;;  %102 = vst [vmem:[#allocation1 + $0x1] ss:$4 sm:$0xff] %v92_v29  ;;  %v3003_v49 = vld [vmem:[#allocation8 + $0x2ac] sm:$0xf]  ;;  %v2882_v50 = vld [vmem:[#allocation8 + $0x2c0] sm:$0xf0] }
  0x32   :  { %731 = vmatpush.bf16.msra.mxu1 %v2753_v21  ;;  %v2688_v52 = vld [vmem:[#allocation8 + $0x128] sm:$0xf]  ;;  %v2958_v53 = vld [vmem:[#allocation8 + $0x13c] sm:$0xf0]  ;;  %v93_v56 = vld [vmem:[#allocation7] sm:$0xf]  ;;  %v2885_v58 = vor.u32 %v3003_v49, %v2882_v50 }
  0x33   :  { %744 = vmatpush.bf16.msra.mxu2 %v2565_v22  ;;  %v2880_v54 = vld [vmem:[#allocation8 + $0x2a8] sm:$0xf]  ;;  %v3006_v55 = vld [vmem:[#allocation8 + $0x2bc] sm:$0xf0]  ;;  %v2949_v59 = vld [vmem:[#allocation8 + $0xfc] sm:$0xf]  ;;  %v2689_v61 = vor.u32 %v2958_v53, %v2688_v52 }
  0x34   :  { %757 = vmatpush.bf16.msra.mxu3 %v2757_v26  ;;  %v2666_v60 = vld [vmem:[#allocation8 + $0x110] sm:$0xf0]  ;;  %v2997_v62 = vld [vmem:[#allocation8 + $0x27c] sm:$0xf]  ;;  %v2881_v0 = vor.u32 %v3006_v55, %v2880_v54  ;;  %v2664_v1 = vld [vmem:[#allocation8 + $0xf8] sm:$0xf] }
  0x35   :  { %719 = vmatpush.bf16.msra.mxu0 %v2537_v33  ;;  %v2858_v63 = vld [vmem:[#allocation8 + $0x290] sm:$0xf0]  ;;  %v2952_v2 = vld [vmem:[#allocation8 + $0x10c] sm:$0xf0]  ;;  %v2943_v3 = vld [vmem:[#allocation8 + $0xcc] sm:$0xf]  ;;  %v2669_v8 = vor.u32 %v2949_v59, %v2666_v60 }
  0x36   :  { %732 = vmatpush.bf16.msra.mxu1 %v2729_v37  ;;  %v2856_v4 = vld [vmem:[#allocation8 + $0x278] sm:$0xf]  ;;  %v3000_v5 = vld [vmem:[#allocation8 + $0x28c] sm:$0xf0]  ;;  %v2861_v9 = vor.u32 %v2997_v62, %v2858_v63  ;;  %v2642_v10 = vld [vmem:[#allocation8 + $0xe0] sm:$0xf0]  ;;  %v2665_v11 = vor.u32 %v2952_v2, %v2664_v1 }
  0x37   :  { %745 = vmatpush.bf16.msra.mxu2 %v2541_v38  ;;  %v2991_v12 = vld [vmem:[#allocation8 + $0x24c] sm:$0xf]  ;;  %v2834_v13 = vld [vmem:[#allocation8 + $0x260] sm:$0xf0]  ;;  %v2857_v14 = vor.u32 %v3000_v5, %v2856_v4  ;;  %v2640_v15 = vld [vmem:[#allocation8 + $0xc8] sm:$0xf]  ;;  %v2645_v19 = vor.u32 %v2943_v3, %v2642_v10 }
  0x38   :  { %758 = vmatpush.bf16.msra.mxu3 %v2733_v45  ;;  %v103_v6 = vld.sshfl [vmem:[#allocation1] sm:$0xff pattern:$0x73625140]  ;;  %v104_v7 = vld.sshfl [vmem:[#allocation1 + $0x8] sm:$0xff pattern:$0x73625140]  ;;  %v2837_v20 = vor.u32 %v2991_v12, %v2834_v13 }
  0x39   :  { %764 = vmatpush.bf16.msrb.mxu0 %v2713_v48  ;;  %109 = vst [vmem:[#allocation1 + $0x2] ss:$4 sm:$0xff] %v93_v56  ;;  %v2946_v16 = vld [vmem:[#allocation8 + $0xdc] sm:$0xf0]  ;;  %vm4844_vm0 = vcmask 1041408   ;;  %vm117_vm1 = vcmask 1043456  }
  0x3a   :  { %777 = vmatpush.bf16.msrb.mxu1 %v2905_v51  ;;  %v2832_v17 = vld [vmem:[#allocation8 + $0x248] sm:$0xf]  ;;  %v2994_v18 = vld [vmem:[#allocation8 + $0x25c] sm:$0xf0]  ;;  %v2937_v21 = vld [vmem:[#allocation8 + $0x9c] sm:$0xf]  ;;  %v2641_v23 = vor.u32 %v2946_v16, %v2640_v15  ;;  %v115_v24 = vsel %vm4844_vm0, %v3507_v43, %v103_v6  ;;  %v116_v25 = vsel %vm4844_vm0, %v3509_v44, %v104_v7 }
  0x3b   :  { %790 = vmatpush.bf16.msrb.mxu2 %v2717_v42  ;;  %v2618_v22 = vld [vmem:[#allocation8 + $0xb0] sm:$0xf0]  ;;  %v2985_v26 = vld [vmem:[#allocation8 + $0x21c] sm:$0xf]  ;;  %v2833_v28 = vor.u32 %v2994_v18, %v2832_v17  ;;  %v2616_v29 = vld [vmem:[#allocation8 + $0x98] sm:$0xf] }
  0x3c   :  { %803 = vmatpush.bf16.msrb.mxu3 %v2909_v46  ;;  %v2810_v27 = vld [vmem:[#allocation8 + $0x230] sm:$0xf0]  ;;  %v2940_v30 = vld [vmem:[#allocation8 + $0xac] sm:$0xf0]  ;;  %v2808_v31 = vld [vmem:[#allocation8 + $0x218] sm:$0xf]  ;;  %v2621_v39 = vor.u32 %v2937_v21, %v2618_v22 }
  0x3d   :  { %765 = vmatpush.bf16.msrb.mxu0 %v2689_v61  ;;  %v2988_v32 = vld [vmem:[#allocation8 + $0x22c] sm:$0xf0]  ;;  %v2813_v40 = vor.u32 %v2985_v26, %v2810_v27  ;;  %v2931_v41 = vld [vmem:[#allocation8 + $0x6c] sm:$0xf]  ;;  %v2594_v42 = vld [vmem:[#allocation8 + $0x80] sm:$0xf0]  ;;  %v2617_v43 = vor.u32 %v2940_v30, %v2616_v29 }
  0x3e   :  { %778 = vmatpush.bf16.msrb.mxu1 %v2881_v0  ;;  %v2979_v44 = vld [vmem:[#allocation8 + $0x1ec] sm:$0xf]  ;;  %v2786_v45 = vld [vmem:[#allocation8 + $0x200] sm:$0xf0]  ;;  %v2809_v46 = vor.u32 %v2988_v32, %v2808_v31  ;;  %v2592_v47 = vld [vmem:[#allocation8 + $0x68] sm:$0xf]  ;;  %v2597_v51 = vor.u32 %v2931_v41, %v2594_v42 }
  0x3f   :  { %791 = vmatpush.bf16.msrb.mxu2 %v2693_v57  ;;  %v2934_v48 = vld [vmem:[#allocation8 + $0x7c] sm:$0xf0]  ;;  %v2784_v49 = vld [vmem:[#allocation8 + $0x1e8] sm:$0xf]  ;;  %v2789_v52 = vor.u32 %v2979_v44, %v2786_v45  ;;  %v2925_v53 = vld [vmem:[#allocation8 + $0x3c] sm:$0xf] }
  0x40   :  { %804 = vmatpush.bf16.msrb.mxu3 %v2885_v58  ;;  %v110_v33 = vld.sshfl [vmem:[#allocation1] sm:$0xff pattern:$0x73625140]  ;;  %v111_v34 = vld.sshfl [vmem:[#allocation1 + $0x8] sm:$0xff pattern:$0x73625140]  ;;  %v2593_v55 = vor.u32 %v2934_v48, %v2592_v47 }
  0x41   :  { %766 = vmatpush.bf16.msrb.mxu0 %v2665_v11  ;;  %v118_v35 = vsel %vm117_vm1, %v115_v24, %v110_v33  ;;  %v119_v36 = vsel %vm117_vm1, %v116_v25, %v111_v34  ;;  %v2982_v50 = vld [vmem:[#allocation8 + $0x1fc] sm:$0xf0]  ;;  %v2570_v54 = vld [vmem:[#allocation8 + $0x50] sm:$0xf0]  ;;  %v2973_v56 = vld [vmem:[#allocation8 + $0x1bc] sm:$0xf] }
  0x42   :  { %779 = vmatpush.bf16.msrb.mxu1 %v2857_v14  ;;  %v3517_v37 = vpack.c.bf16 %v118_v35, %v118_v35  ;;  %v3519_v38 = vpack.c.bf16 %v119_v36, %v119_v36  ;;  %v2762_v57 = vld [vmem:[#allocation8 + $0x1d0] sm:$0xf0]  ;;  %v2785_v58 = vor.u32 %v2982_v50, %v2784_v49  ;;  %v2568_v59 = vld [vmem:[#allocation8 + $0x38] sm:$0xf]  ;;  %v2928_v60 = vld [vmem:[#allocation8 + $0x4c] sm:$0xf0]  ;;  %v2573_v63 = vor.u32 %v2925_v53, %v2570_v54 }
  0x43   :  { %792 = vmatpush.bf16.msrb.mxu2 %v2669_v8  ;;  %v2760_v61 = vld [vmem:[#allocation8 + $0x1b8] sm:$0xf]  ;;  %v2976_v62 = vld [vmem:[#allocation8 + $0x1cc] sm:$0xf0]  ;;  %v2765_v0 = vor.u32 %v2973_v56, %v2762_v57  ;;  %v2919_v1 = vld [vmem:[#allocation8 + $0xc] sm:$0xf]  ;;  %v2569_v3 = vor.u32 %v2928_v60, %v2568_v59 }
  0x44   :  { %805 = vmatpush.bf16.msrb.mxu3 %v2861_v9  ;;  %720 = vmatmul.bf16.vlgmr.msra.gmra.mxu0 %v3517_v37  ;;  %v2546_v2 = vld [vmem:[#allocation8 + $0x20] sm:$0xf0]  ;;  %v2967_v4 = vld [vmem:[#allocation8 + $0x18c] sm:$0xf]  ;;  %v2761_v6 = vor.u32 %v2976_v62, %v2760_v61  ;;  %v2544_v7 = vld [vmem:[#allocation8 + $0x8] sm:$0xf] }
  0x45   :  { %767 = vmatpush.bf16.msrb.mxu0 %v2641_v23  ;;  %733 = vmatmul.bf16.vlgmr.msra.gmra.mxu1 %v3519_v38  ;;  %v2738_v5 = vld [vmem:[#allocation8 + $0x1a0] sm:$0xf0]  ;;  %v2922_v8 = vld [vmem:[#allocation8 + $0x1c] sm:$0xf0]  ;;  %v2736_v9 = vld [vmem:[#allocation8 + $0x188] sm:$0xf]  ;;  %v2549_v11 = vor.u32 %v2919_v1, %v2546_v2 }
  0x46   :  { %780 = vmatpush.bf16.msrb.mxu1 %v2833_v28  ;;  %746 = vmatmul.bf16.vlgmr.msra.gmra.mxu2 %v3517_v37  ;;  %v2970_v10 = vld [vmem:[#allocation8 + $0x19c] sm:$0xf0]  ;;  %v2741_v12 = vor.u32 %v2967_v4, %v2738_v5  ;;  %v2545_v13 = vor.u32 %v2922_v8, %v2544_v7  ;;  %vm932_vm2 = vcmask 1042434   ;;  %s3461_s2 = smov [#allocation11]   ;;  %s2522_s19 = sshll.u32 %s4839_s5, 4  ;;  %s2523_s19 = int_to_ptr.hbm [resolvable:$true] %s2522_s19 }
  0x47   :  { %793 = vmatpush.bf16.msrb.mxu2 %v2645_v19  ;;  %759 = vmatmul.bf16.vlgmr.msra.gmra.mxu3 %v3519_v38  ;;  %v2737_v14 = vor.u32 %v2970_v10, %v2736_v9  ;;  %v218_v15 = vld [vmem:[#allocation10] sm:$0x3f]  ;;  %s2520_s4 = sshll.u32 %s3461_s2, 4  ;;  %s2521_s4 = int_to_ptr.vmem [resolvable:$true] %s2520_s4 }
  0x48   :  { %806 = vmatpush.bf16.msrb.mxu3 %v2837_v20  ;;  %v220_v16 = vperm.slane %v218_v15, 0  ;;  %v221_v21 = vperm.slane %v218_v15, 1  ;;  %v222_v30 = vperm.slane %v218_v15, 2  ;;  %v223_v34 = vperm.slane %v218_v15, 3 }
  0x49   :  { %768 = vmatpush.bf16.msrb.mxu0 %v2617_v43 }
  0x4a   :  { %781 = vmatpush.bf16.msrb.mxu1 %v2809_v46 }
  0x4b   :  { %794 = vmatpush.bf16.msrb.mxu2 %v2621_v39 }
  0x4c   :  { %807 = vmatpush.bf16.msrb.mxu3 %v2813_v40 }
  0x4d   :  { %769 = vmatpush.bf16.msrb.mxu0 %v2593_v55 }
  0x4e   :  { %782 = vmatpush.bf16.msrb.mxu1 %v2785_v58 }
  0x4f   :  { %795 = vmatpush.bf16.msrb.mxu2 %v2597_v51 }
  0x50   :  { %808 = vmatpush.bf16.msrb.mxu3 %v2789_v52  ;;  %v4840_v52 = vmov 0  }
  0x51   :  { %770 = vmatpush.bf16.msrb.mxu0 %v2569_v3  ;;  %3025 = vset.pattern.permute.xlu2 %v4840_v52 }
  0x52   :  { %783 = vmatpush.bf16.msrb.mxu1 %v2761_v6  ;;  %3026 = vset.pattern.permute.xlu1 %v4840_v52 }
  0x53   :  { %796 = vmatpush.bf16.msrb.mxu2 %v2573_v63 }
  0x54   :  { %809 = vmatpush.bf16.msrb.mxu3 %v2765_v0 }
  0x55   :  { %771 = vmatpush.bf16.msrb.mxu0 %v2545_v13 }
  0x56   :  { %784 = vmatpush.bf16.msrb.mxu1 %v2737_v14 }
  0x57   :  { %797 = vmatpush.bf16.msrb.mxu2 %v2549_v11 }
  0x58   :  { %810 = vmatpush.bf16.msrb.mxu3 %v2741_v12  ;;  %772 = vmatmul.bf16.vlgmr.msrb.gmra.mxu0 %v3517_v37 }
  0x59   :  { %785 = vmatmul.bf16.vlgmr.msrb.gmra.mxu1 %v3519_v38 }
  0x5a   :  { %798 = vmatmul.bf16.vlgmr.msrb.gmra.mxu2 %v3517_v37 }
  0x5b   :  { %811 = vmatmul.bf16.vlgmr.msrb.gmra.mxu3 %v3519_v38 }
  0xc1   :  { %v721_v17 = vpop.f32.mrf.mxu0 }
  0xc2   :  { %v734_v18 = vpop.f32.mrf.mxu1  ;;  %v722_v19 = vadd.f32 %v721_v17, %v220_v16 }
  0xc4   :  { %v735_v20 = vadd.f32 %v734_v18, %v722_v19 }
  0xc6   :  { %868 = vxpose.xlu0.b32.start.end [1/1] (short) %v735_v20, 128 }
  0xc9   :  { %v747_v22 = vpop.f32.mrf.mxu2  ;;  %v723_v24 = vpop.f32.mrf.mxu0 }
  0xca   :  { %v760_v23 = vpop.f32.mrf.mxu3  ;;  %v736_v25 = vpop.f32.mrf.mxu1  ;;  %v748_v26 = vadd.f32 %v747_v22, %v221_v21 }
  0xcc   :  { %v761_v27 = vadd.f32 %v760_v23, %v748_v26 }
  0xd1   :  { %v749_v28 = vpop.f32.mrf.mxu2 }
  0xd2   :  { %v762_v29 = vpop.f32.mrf.mxu3 }
  0xd5   :  { %v773_v31 = vpop.f32.mrf.mxu0 }
  0xd6   :  { %v786_v32 = vpop.f32.mrf.mxu1  ;;  %v774_v33 = vadd.f32 %v773_v31, %v222_v30 }
  0xd8   :  { %v3529_v35 = vadd.f32 %v786_v32, %v774_v33 }
  0xda   :  { %4953 = vst [vmem:[#allocation16_spill] sm:$0xff] %v3529_v35  ;;  %v933_v42 = vsel %vm932_vm2, %v3529_v35, -inf  ;;  %v938_v49 = vsel %vm932_vm2, %v3529_v35, inf }
  0xdd   :  { %v799_v36 = vpop.f32.mrf.mxu2  ;;  %v775_v43 = vpop.f32.mrf.mxu0 }
  0xde   :  { %v812_v39 = vpop.f32.mrf.mxu3  ;;  %v800_v40 = vadd.f32 %v799_v36, %v223_v34  ;;  %v788_v44 = vpop.f32.mrf.mxu1  ;;  %v4842_v36 = vmov 1  }
  0xe0   :  { %v3531_v41 = vadd.f32 %v812_v39, %v800_v40 }
  0xe2   :  { %4954 = vst [vmem:[#allocation17_spill] sm:$0xff] %v3531_v41  ;;  %v934_v45 = vsel %vm932_vm2, %v3531_v41, -inf  ;;  %v939_v50 = vsel %vm932_vm2, %v3531_v41, inf }
  0xe3   :  { %v935_v46 = vmax.f32 %v933_v42, %v934_v45  ;;  %v940_v51 = vmin.f32 %v938_v49, %v939_v50 }
  0xe5   :  { %936 = vmax.xlane.f32.xlu1 %v935_v46  ;;  %v801_v47 = vpop.f32.mrf.mxu2 }
  0xe6   :  { %v814_v48 = vpop.f32.mrf.mxu3 }
  0xed   :  { %941 = vmin.xlane.f32.xlu1 %v940_v51 }
 0x146   :  { %900 = vxpose.xlu0.b32.start.end [1/1] (short) %v761_v27, 128 }
 0x158   :  { %v937_v18 = vpop.xlane.xlu1 %936 }
 0x159   :  { %v3629_v23 = vperm.slane %v937_v18, 2 }
 0x160   :  { %v942_v22 = vpop.xlane.xlu1 %941 }
 0x161   :  { %v3631_v24 = vperm.slane %v942_v22, 2 }
 0x16a   :  { %v3539_v53 = vpop.trf.xlu0 }
 0x16b   :  { %1075 = vperm.xlu2 %3025, %v3539_v53   ;;  %v976_v27 = vmul.f32 %v3629_v23, %v3539_v53  ;;  %v1009_v28 = vmul.f32 %v3631_v24, %v3539_v53  ;;  %vm4855_vm3 = vcmp.gt.f32.partialorder %v3539_v53, 0.0 }
 0x16d   :  { %v1041_v30 = vsel %vm4855_vm3, %v976_v27, %v1009_v28 }
 0x172   :  { %v3542_v54 = vpop.trf.xlu0 }
 0x173   :  { %v977_v40 = vmul.f32 %v3629_v23, %v3542_v54  ;;  %v1010_v42 = vmul.f32 %v3631_v24, %v3542_v54  ;;  %vm4856_vm5 = vcmp.gt.f32.partialorder %v3542_v54, 0.0 }
 0x175   :  { %v1042_v46 = vsel %vm4856_vm5, %v977_v40, %v1010_v42 }
 0x17a   :  { %v3544_v55 = vpop.trf.xlu0 }
 0x17b   :  { %v978_v32 = vmul.f32 %v3629_v23, %v3544_v55  ;;  %v1011_v33 = vmul.f32 %v3631_v24, %v3544_v55  ;;  %vm4859_vm4 = vcmp.gt.f32.partialorder %v3544_v55, 0.0 }
 0x17d   :  { %v1043_v34 = vsel %vm4859_vm4, %v978_v32, %v1011_v33 }
 0x182   :  { %v3546_v56 = vpop.trf.xlu0 }
 0x183   :  { %v979_v49 = vmul.f32 %v3629_v23, %v3546_v56  ;;  %v1012_v50 = vmul.f32 %v3631_v24, %v3546_v56  ;;  %vm946_vm7 = vcmp.gt.f32.partialorder %v3546_v56, 0.0 }
 0x185   :  { %v1044_v22 = vsel %vm946_vm7, %v979_v49, %v1012_v50 }
 0x18a   :  { %v3548_v57 = vpop.trf.xlu0 }
 0x18b   :  { %v980_v43 = vmul.f32 %v3629_v23, %v3548_v57  ;;  %v1013_v44 = vmul.f32 %v3631_v24, %v3548_v57  ;;  %vm4918_vm6 = vcmp.gt.f32.partialorder %v3548_v57, 0.0 }
 0x18d   :  { %v1045_v47 = vsel %vm4918_vm6, %v980_v43, %v1013_v44 }
 0x192   :  { %v3550_v58 = vpop.trf.xlu0 }
 0x193   :  { %v981_v32 = vmul.f32 %v3629_v23, %v3550_v58  ;;  %v1014_v33 = vmul.f32 %v3631_v24, %v3550_v58  ;;  %vm4922_vm9 = vcmp.gt.f32.partialorder %v3550_v58, 0.0 }
 0x195   :  { %v1046_v42 = vsel %vm4922_vm9, %v981_v32, %v1014_v33 }
 0x19a   :  { %v3552_v59 = vpop.trf.xlu0 }
 0x19b   :  { %v982_v51 = vmul.f32 %v3629_v23, %v3552_v59  ;;  %v1015_v18 = vmul.f32 %v3631_v24, %v3552_v59  ;;  %vm949_vm8 = vcmp.gt.f32.partialorder %v3552_v59, 0.0 }
 0x19d   :  { %v1047_v27 = vsel %vm949_vm8, %v982_v51, %v1015_v18 }
 0x1a2   :  { %v3554_v60 = vpop.trf.xlu0 }
 0x1a3   :  { %v1016_v49 = vmul.f32 %v3631_v24, %v3554_v60  ;;  %vm950_vm11 = vcmp.gt.f32.partialorder %v3554_v60, 0.0 }
 0x1aa   :  { %v3556_v61 = vpop.trf.xlu0 }
 0x1ab   :  { %4955 = vst [vmem:[#allocation18_spill] sm:$0xff] %v3556_v61  ;;  %v1017_v40 = vmul.f32 %v3631_v24, %v3556_v61  ;;  %vm4847_vm10 = vcmp.gt.f32.partialorder %v3556_v61, 0.0 }
 0x1ad   :  { %3027 = vset.pattern.permute.xlu0 %v4840_v52 }
 0x1b2   :  { %v3559_v62 = vpop.trf.xlu0 }
 0x1b3   :  { %4956 = vst [vmem:[#allocation19_spill] sm:$0xff] %v3559_v62  ;;  %v985_v33 = vmul.f32 %v3629_v23, %v3559_v62  ;;  %vm4848_vm13 = vcmp.gt.f32.partialorder %v3559_v62, 0.0 }
 0x1ba   :  { %v3561_v63 = vpop.trf.xlu0 }
 0x1bb   :  { %v986_v50 = vmul.f32 %v3629_v23, %v3561_v63  ;;  %v1019_v51 = vmul.f32 %v3631_v24, %v3561_v63  ;;  %vm4851_vm12 = vcmp.gt.f32.partialorder %v3561_v63, 0.0 }
 0x1c2   :  { %v3563_v0 = vpop.trf.xlu0 }
 0x1c3   :  { %vm4852_vm15 = vcmp.gt.f32.partialorder %v3563_v0, 0.0 }
 0x1c5   :  { %v3615_v16 = vpop.permute.xlu2 %1075 }
 0x1c6   :  { %4959 = vst [vmem:[#allocation22_spill] sm:$0xff] %v3615_v16 }
 0x1ca   :  { %v3565_v1 = vpop.trf.xlu0 }
 0x1cb   :  { %vm955_vm14 = vcmp.gt.f32.partialorder %v3565_v1, 0.0 }
 0x1d2   :  { %v3567_v2 = vpop.trf.xlu0 }
 0x1d3   :  { %v1022_v52 = vmul.f32 %v3631_v24, %v3567_v2  ;;  %vm956_vm2 = vcmp.gt.f32.partialorder %v3567_v2, 0.0 }
 0x1da   :  { %v3569_v3 = vpop.trf.xlu0 }
 0x1db   :  { %vm957_vm1 = vcmp.gt.f32.partialorder %v3569_v3, 0.0 }
 0x1e2   :  { %v3571_v4 = vpop.trf.xlu0 }
 0x1e3   :  { %vm958_vm6 = vcmp.gt.f32.partialorder %v3571_v4, 0.0 }
 0x1ea   :  { %v3573_v5 = vpop.trf.xlu0 }
 0x1eb   :  { %1155 = vperm.xlu2 %3025, %v3573_v5   ;;  %vm4880_vm0 = vcmp.gt.f32.partialorder %v3573_v5, 0.0 }
 0x1f2   :  { %v3576_v6 = vpop.trf.xlu0 }
 0x1f3   :  { %1080 = vperm.xlu2 %3025, %v3542_v54   ;;  %1160 = vperm.xlu1 %3026, %v3576_v6  }
 0x1fa   :  { %v3580_v7 = vpop.trf.xlu0 }
 0x1fb   :  { %1085 = vperm.xlu1 %3026, %v3544_v55   ;;  %1165 = vperm.xlu2 %3025, %v3580_v7  }
 0x202   :  { %v3584_v8 = vpop.trf.xlu0 }
 0x203   :  { %1090 = vperm.xlu2 %3025, %v3546_v56   ;;  %1170 = vperm.xlu1 %3026, %v3584_v8  }
 0x20a   :  { %v3588_v9 = vpop.trf.xlu0 }
 0x20b   :  { %1095 = vperm.xlu2 %3025, %v3548_v57  }
 0x212   :  { %v3591_v10 = vpop.trf.xlu0 }
 0x213   :  { %1175 = vperm.xlu2 %3025, %v3588_v9   ;;  %1180 = vperm.xlu1 %3026, %v3591_v10   ;;  %v1030_v16 = vmul.f32 %v3631_v24, %v3591_v10  ;;  %vm964_vm3 = vcmp.gt.f32.partialorder %v3591_v10, 0.0 }
 0x21a   :  { %v3595_v11 = vpop.trf.xlu0 }
 0x21b   :  { %1100 = vperm.xlu2 %3025, %v3550_v58   ;;  %1110 = vperm.xlu1 %3026, %v3554_v60   ;;  %vm965_vm5 = vcmp.gt.f32.partialorder %v3595_v11, 0.0 }
 0x222   :  { %v3599_v12 = vpop.trf.xlu0 }
 0x223   :  { %4957 = vst [vmem:[#allocation20_spill] sm:$0xff] %v3599_v12  ;;  %1105 = vperm.xlu2 %3025, %v3552_v59   ;;  %1190 = vperm.xlu1 %3026, %v3599_v12   ;;  %vm4863_vm4 = vcmp.gt.f32.partialorder %v3599_v12, 0.0 }
 0x22a   :  { %v3603_v13 = vpop.trf.xlu0 }
 0x22b   :  { %4958 = vst [vmem:[#allocation21_spill] sm:$0xff] %v3603_v13  ;;  %1185 = vperm.xlu2 %3025, %v3595_v11   ;;  %1120 = vperm.xlu1 %3026, %v3559_v62  }
 0x232   :  { %v3607_v14 = vpop.trf.xlu0 }
 0x233   :  { %1115 = vperm.xlu2 %3025, %v3556_v61   ;;  %1200 = vperm.xlu1 %3026, %v3607_v14  }
 0x23a   :  { %v3611_v15 = vpop.trf.xlu0 }
 0x23b   :  { %1195 = vperm.xlu2 %3025, %v3603_v13   ;;  %1130 = vperm.xlu1 %3026, %v3563_v0  }
 0x242   :  { %v3617_v17 = vpop.trf.xlu0 }
 0x243   :  { %1125 = vperm.xlu2 %3025, %v3561_v63   ;;  %1210 = vperm.xlu1 %3026, %v3617_v17  }
 0x245   :  { %v3621_v19 = vpop.permute.xlu2 %1155 }
 0x246   :  { %4960 = vst [vmem:[#allocation23_spill] sm:$0xff] %v3621_v19  ;;  %v1026_v19 = vmul.f32 %v3631_v24, %v3576_v6 }
 0x24a   :  { %v3623_v20 = vpop.trf.xlu0 }
 0x24b   :  { %1205 = vperm.xlu2 %3025, %v3611_v15   ;;  %1140 = vperm.xlu1 %3026, %v3567_v2  }
 0x24d   :  { %v3627_v21 = vpop.permute.xlu2 %1080 }
 0x24e   :  { %4961 = vst [vmem:[#allocation24_spill] sm:$0xff] %v3627_v21  ;;  %v1032_v21 = vmul.f32 %v3631_v24, %v3599_v12 }
 0x252   :  { %v3633_v25 = vpop.trf.xlu0 }
 0x253   :  { %1135 = vperm.xlu2 %3025, %v3565_v1   ;;  %1220 = vperm.xlu1 %3026, %v3633_v25  }
 0x255   :  { %v3637_v26 = vpop.permute.xlu2 %1165 }
 0x256   :  { %4962 = vst [vmem:[#allocation25_spill] sm:$0xff] %v3637_v26  ;;  %v1028_v26 = vmul.f32 %v3631_v24, %v3584_v8 }
 0x25a   :  { %v3644_v29 = vpop.trf.xlu0 }
 0x25b   :  { %1215 = vperm.xlu2 %3025, %v3623_v20   ;;  %1301 = vperm.xlu1 %3026, %v1041_v30  }
 0x25c   :  { %1225 = vperm.xlu0 %3027, %v3644_v29  }
 0x25d   :  { %v3650_v31 = vpop.permute.xlu2 %1090 }
 0x25e   :  { %4963 = vst [vmem:[#allocation26_spill] sm:$0xff] %v3650_v31  ;;  %v1002_v31 = vmul.f32 %v3629_v23, %v3611_v15 }
 0x263   :  { %1145 = vperm.xlu2 %3025, %v3569_v3   ;;  %1311 = vperm.xlu1 %3026, %v1043_v34   ;;  %v984_v34 = vmul.f32 %v3629_v23, %v3556_v61 }
 0x264   :  { %3034 = vset.pattern.permute.xlu0 %v4842_v36  ;;  %v992_v36 = vmul.f32 %v3629_v23, %v3573_v5 }
 0x265   :  { %1904 = vperm.xlu0 %3034, %v3563_v0   ;;  %v3662_v39 = vpop.permute.xlu2 %1095  ;;  %v3674_v45 = vpop.permute.xlu1 %1160  ;;  %v1049_v43 = vsel %vm4847_vm10, %v984_v34, %v1017_v40  ;;  %v1018_v34 = vmul.f32 %v3631_v24, %v3559_v62  ;;  %v988_v40 = vmul.f32 %v3629_v23, %v3565_v1  ;;  %vm4860_vm10 = vcmp.gt.f32.partialorder %v3576_v6, 0.0 }
 0x266   :  { %4964 = vst [vmem:[#allocation27_spill] sm:$0xff] %v3662_v39  ;;  %v1036_v39 = vmul.f32 %v3631_v24, %v3617_v17 }
 0x267   :  { %4965 = vst [vmem:[#allocation28_spill] sm:$0xff] %v3674_v45  ;;  %v994_v45 = vmul.f32 %v3629_v23, %v3580_v7 }
 0x26b   :  { %1306 = vperm.xlu2 %3025, %v1042_v46   ;;  %1321 = vperm.xlu1 %3026, %v1045_v47   ;;  %v983_v47 = vmul.f32 %v3629_v23, %v3554_v60 }
 0x26d   :  { %1924 = vperm.xlu0 %3034, %v3573_v5   ;;  %v3681_v48 = vpop.permute.xlu2 %1175  ;;  %v3697_v28 = vpop.permute.xlu1 %1085  ;;  %v1048_v18 = vsel %vm950_vm11, %v983_v47, %v1016_v49 }
 0x26e   :  { %4966 = vst [vmem:[#allocation29_spill] sm:$0xff] %v3681_v48  ;;  %v998_v48 = vmul.f32 %v3629_v23, %v3595_v11 }
 0x26f   :  { %4967 = vst [vmem:[#allocation30_spill] sm:$0xff] %v3697_v28  ;;  %v1034_v28 = vmul.f32 %v3631_v24, %v3607_v14 }
 0x273   :  { %1316 = vperm.xlu2 %3025, %v1044_v22   ;;  %1331 = vperm.xlu1 %3026, %v1047_v27   ;;  %v1051_v22 = vsel %vm4851_vm12, %v986_v50, %v1019_v51  ;;  %v987_v51 = vmul.f32 %v3629_v23, %v3563_v0  ;;  %vm962_vm12 = vcmp.gt.f32.partialorder %v3584_v8, 0.0 }
 0x275   :  { %1936 = vperm.xlu0 %3034, %v3584_v8   ;;  %v3700_v30 = vpop.permute.xlu2 %1100  ;;  %v3716_v44 = vpop.permute.xlu1 %1170 }
 0x276   :  { %4968 = vst [vmem:[#allocation31_spill] sm:$0xff] %v3700_v30  ;;  %v1004_v30 = vmul.f32 %v3629_v23, %v3623_v20 }
 0x277   :  { %4969 = vst [vmem:[#allocation32_spill] sm:$0xff] %v3716_v44  ;;  %v996_v44 = vmul.f32 %v3629_v23, %v3588_v9 }
 0x27b   :  { %1326 = vperm.xlu2 %3025, %v1046_v42   ;;  %1341 = vperm.xlu1 %3026, %v1049_v43   ;;  %v1021_v42 = vmul.f32 %v3631_v24, %v3565_v1  ;;  %v1050_v43 = vsel %vm4848_vm13, %v985_v33, %v1018_v34  ;;  %v1023_v33 = vmul.f32 %v3631_v24, %v3569_v3  ;;  %vm4870_vm13 = vcmp.gt.f32.partialorder %v3580_v7, 0.0 }
 0x27d   :  { %1980 = vperm.xlu0 %3034, %v3644_v29   ;;  %v3719_v46 = vpop.permute.xlu2 %1105  ;;  %v1053_v47 = vsel %vm955_vm14, %v988_v40, %v1021_v42 }
 0x27e   :  { %4970 = vst [vmem:[#allocation33_spill] sm:$0xff] %v3719_v46 }
 0x283   :  { %1336 = vperm.xlu2 %3025, %v1048_v18   ;;  %1351 = vperm.xlu1 %3026, %v1051_v22   ;;  %v1020_v18 = vmul.f32 %v3631_v24, %v3563_v0  ;;  %v990_v22 = vmul.f32 %v3629_v23, %v3569_v3 }
 0x285   :  { %v3735_v27 = vpop.permute.xlu1 %1180  ;;  %v3737_v32 = vpop.permute.xlu2 %1185  ;;  %v1052_v34 = vsel %vm4852_vm15, %v987_v51, %v1020_v18  ;;  %v1055_v40 = vsel %vm957_vm1, %v990_v22, %v1023_v33  ;;  %v1025_v51 = vmul.f32 %v3631_v24, %v3573_v5  ;;  %vm963_vm15 = vcmp.gt.f32.partialorder %v3588_v9, 0.0 }
 0x286   :  { %4971 = vst [vmem:[#allocation34_spill] sm:$0xff] %v3735_v27  ;;  %v1000_v27 = vmul.f32 %v3629_v23, %v3603_v13 }
 0x287   :  { %v1057_v22 = vsel %vm4880_vm0, %v992_v36, %v1025_v51  ;;  %vm1750_vm0 = vcmask 1043459  }
 0x28b   :  { %1346 = vperm.xlu2 %3025, %v1050_v43   ;;  %1361 = vperm.xlu1 %3026, %v1053_v47   ;;  %v989_v47 = vmul.f32 %v3629_v23, %v3567_v2 }
 0x28d   :  { %v3753_v49 = vpop.permute.xlu1 %1110  ;;  %v3755_v50 = vpop.permute.xlu2 %1115  ;;  %v1054_v18 = vsel %vm956_vm2, %v989_v47, %v1022_v52  ;;  %v1027_v52 = vmul.f32 %v3631_v24, %v3580_v7 }
 0x28e   :  { %4972 = vst [vmem:[#allocation35_spill] sm:$0xff] %v3753_v49 }
 0x28f   :  { %v1059_v47 = vsel %vm4870_vm13, %v994_v45, %v1027_v52  ;;  %vm972_vm13 = vcmp.gt.f32.partialorder %v3633_v25, 0.0 }
 0x293   :  { %1356 = vperm.xlu2 %3025, %v1052_v34   ;;  %1371 = vperm.xlu1 %3026, %v1055_v40   ;;  %v993_v40 = vmul.f32 %v3629_v23, %v3576_v6 }
 0x295   :  { %v3771_v42 = vpop.permute.xlu1 %1190  ;;  %v3773_v43 = vpop.permute.xlu2 %1195  ;;  %v1058_v36 = vsel %vm4860_vm10, %v993_v40, %v1026_v19  ;;  %v1029_v19 = vmul.f32 %v3631_v24, %v3588_v9  ;;  %vm4864_vm10 = vcmp.gt.f32.partialorder %v3603_v13, 0.0 }
 0x297   :  { %v1061_v40 = vsel %vm963_vm15, %v996_v44, %v1029_v19 }
 0x29b   :  { %1366 = vperm.xlu2 %3025, %v1054_v18   ;;  %1381 = vperm.xlu1 %3026, %v1057_v22   ;;  %v995_v22 = vmul.f32 %v3629_v23, %v3584_v8 }
 0x29d   :  { %v3789_v33 = vpop.permute.xlu1 %1120  ;;  %v3791_v34 = vpop.permute.xlu2 %1125  ;;  %v1060_v45 = vsel %vm962_vm12, %v995_v22, %v1028_v26  ;;  %v1031_v26 = vmul.f32 %v3631_v24, %v3595_v11 }
 0x29f   :  { %v1063_v22 = vsel %vm965_vm5, %v998_v48, %v1031_v26 }
 0x2a3   :  { %1386 = vperm.xlu2 %3025, %v1058_v36   ;;  %1391 = vperm.xlu1 %3026, %v1059_v47   ;;  %v997_v47 = vmul.f32 %v3629_v23, %v3591_v10 }
 0x2a5   :  { %v3807_v51 = vpop.permute.xlu1 %1200  ;;  %v3809_v18 = vpop.permute.xlu2 %1205  ;;  %v1062_v44 = vsel %vm964_vm3, %v997_v47, %v1030_v16  ;;  %v1033_v16 = vmul.f32 %v3631_v24, %v3603_v13 }
 0x2a7   :  { %v1065_v47 = vsel %vm4864_vm10, %v1000_v27, %v1033_v16  ;;  %vm4868_vm10 = vcmp.gt.f32.partialorder %v3611_v15, 0.0 }
 0x2ab   :  { %1396 = vperm.xlu2 %3025, %v1060_v45   ;;  %1401 = vperm.xlu1 %3026, %v1061_v40   ;;  %v999_v40 = vmul.f32 %v3629_v23, %v3599_v12 }
 0x2ad   :  { %v3825_v52 = vpop.permute.xlu1 %1130  ;;  %v3827_v36 = vpop.permute.xlu2 %1135  ;;  %v1064_v48 = vsel %vm4863_vm4, %v999_v40, %v1032_v21  ;;  %v1035_v21 = vmul.f32 %v3631_v24, %v3611_v15  ;;  %vm4867_vm4 = vcmp.gt.f32.partialorder %v3607_v14, 0.0 }
 0x2af   :  { %v1067_v40 = vsel %vm4868_vm10, %v1002_v31, %v1035_v21  ;;  %vm971_vm10 = vcmp.gt.f32.partialorder %v3623_v20, 0.0 }
 0x2b3   :  { %1406 = vperm.xlu2 %3025, %v1062_v44   ;;  %1411 = vperm.xlu1 %3026, %v1063_v22   ;;  %v1001_v22 = vmul.f32 %v3629_v23, %v3607_v14 }
 0x2b5   :  { %v3843_v19 = vpop.permute.xlu1 %1210  ;;  %v3845_v45 = vpop.permute.xlu2 %1215  ;;  %v1066_v27 = vsel %vm4867_vm4, %v1001_v22, %v1034_v28  ;;  %v1037_v28 = vmul.f32 %v3631_v24, %v3623_v20  ;;  %vm970_vm4 = vcmp.gt.f32.partialorder %v3617_v17, 0.0 }
 0x2b7   :  { %v1069_v22 = vsel %vm971_vm10, %v1004_v30, %v1037_v28 }
 0x2bb   :  { %1416 = vperm.xlu2 %3025, %v1064_v48   ;;  %1421 = vperm.xlu1 %3026, %v1065_v47   ;;  %v1003_v47 = vmul.f32 %v3629_v23, %v3617_v17 }
 0x2bd   :  { %v1141_v26 = vpop.permute.xlu1 %1140  ;;  %v3861_v44 = vpop.permute.xlu2 %1145  ;;  %v1068_v31 = vsel %vm970_vm4, %v1003_v47, %v1036_v39  ;;  %v4976_v47 = vmov 1  }
 0x2c3   :  { %1426 = vperm.xlu2 %3025, %v1066_v27   ;;  %1431 = vperm.xlu1 %3026, %v1067_v40   ;;  %v1005_v40 = vmul.f32 %v3629_v23, %v3633_v25 }
 0x2c5   :  { %v3877_v16 = vpop.permute.xlu2 %1306  ;;  %v3879_v48 = vpop.permute.xlu1 %1220 }
 0x2c6   :  { %4973 = vst [vmem:[#allocation36_spill] sm:$0xff] %v3877_v16  ;;  %v1038_v16 = vmul.f32 %v3631_v24, %v3633_v25 }
 0x2c8   :  { %v1070_v39 = vsel %vm972_vm13, %v1005_v40, %v1038_v16 }
 0x2cb   :  { %1436 = vperm.xlu2 %3025, %v1068_v31   ;;  %1441 = vperm.xlu1 %3026, %v1069_v22  }
 0x2cd   :  { %v3895_v21 = vpop.permute.xlu2 %1316  ;;  %v3897_v27 = vpop.permute.xlu1 %1301 }
 0x2ce   :  { %4974 = vst [vmem:[#allocation37_spill] sm:$0xff] %v3895_v21  ;;  %v3920_v21 = vperm.slane %v3531_v41, 2 }
 0x2cf   :  { %4975 = vst [vmem:[#allocation38_spill] sm:$0xff] %v3897_v27  ;;  %v3917_v27 = vperm.slane %v3529_v35, 2 }
 0x2d0   :  { %v3928_v40 = vmul.f32 %v3920_v21, %v3789_v33 }
 0x2d1   :  { %v3924_v16 = vmul.f32 %v3917_v27, %v3789_v33  ;;  %v3940_v46 = vmul.f32 %v3917_v27, %v3755_v50  ;;  %v3948_v33 = vmul.f32 %v3917_v27, %v3825_v52  ;;  %v3972_v13 = vmul.f32 %v3917_v27, %v3791_v34 }
 0x2d2   :  { %4982 = vst [vmem:[#allocation44_spill] sm:$0xff] %v3928_v40  ;;  %v3979_v40 = vmul.f32 %v3917_v27, %v1141_v26 }
 0x2d3   :  { %1446 = vperm.xlu2 %3025, %v1070_v39   ;;  %3028 = vset.pattern.permute.xlu1 %v4976_v47  ;;  %4981 = vst [vmem:[#allocation43_spill] sm:$0xff] %v3924_v16  ;;  %v1752_v16 = vsel %vm1750_vm0, %v3531_v41, -inf }
 0x2d4   :  { %4985 = vst [vmem:[#allocation47_spill] sm:$0xff] %v3940_v46 }
 0x2d5   :  { %v3907_v30 = vpop.permute.xlu2 %1326  ;;  %v3909_v28 = vpop.permute.xlu1 %1311  ;;  %4987 = vst [vmem:[#allocation49_spill] sm:$0xff] %v3948_v33  ;;  %v991_v33 = vmul.f32 %v3629_v23, %v3571_v4 }
 0x2d6   :  { %4977 = vst [vmem:[#allocation39_spill] sm:$0xff] %v3907_v30 }
 0x2d7   :  { %4978 = vst [vmem:[#allocation40_spill] sm:$0xff] %v3909_v28 }
 0x2d8   :  { %4991 = vst [vmem:[#allocation53_spill] sm:$0xff] %v3972_v13  ;;  %v4156_v13 = vmul.f32 %v3920_v21, %v3809_v18 }
 0x2da   :  { %5022 = vst [vmem:[#allocation83_spill] sm:$0xff] %v4156_v13  ;;  %v3007_v13 = vld [vmem:[#allocation8 + $0x2c4] sm:$0xf0] }
 0x2db   :  { %3029 = vset.pattern.permute.xlu2 %v4976_v47 }
 0x2dd   :  { %v3912_v31 = vpop.permute.xlu2 %1336  ;;  %v3914_v22 = vpop.permute.xlu1 %1321 }
 0x2de   :  { %4979 = vst [vmem:[#allocation41_spill] sm:$0xff] %v3912_v31  ;;  %v3944_v31 = vmul.f32 %v3920_v21, %v3755_v50  ;;  %v3976_v50 = vmul.f32 %v3920_v21, %v3791_v34 }
 0x2df   :  { %4980 = vst [vmem:[#allocation42_spill] sm:$0xff] %v3914_v22 }
 0x2e0   :  { %4986 = vst [vmem:[#allocation48_spill] sm:$0xff] %v3944_v31 }
 0x2e1   :  { %4992 = vst [vmem:[#allocation54_spill] sm:$0xff] %v3976_v50 }
 0x2e5   :  { %v3930_v39 = vpop.permute.xlu2 %1346  ;;  %v3932_v28 = vpop.permute.xlu1 %1331 }
 0x2e6   :  { %4983 = vst [vmem:[#allocation45_spill] sm:$0xff] %v3930_v39  ;;  %v3982_v39 = vmul.f32 %v3920_v21, %v1141_v26  ;;  %v1756_v26 = vsel %vm1750_vm0, %v3529_v35, inf }
 0x2e7   :  { %4984 = vst [vmem:[#allocation46_spill] sm:$0xff] %v3932_v28  ;;  %v3952_v28 = vmul.f32 %v3920_v21, %v3825_v52  ;;  %v1751_v52 = vsel %vm1750_vm0, %v3529_v35, -inf }
 0x2e8   :  { %v1753_v12 = vmax.f32 %v1751_v52, %v1752_v16  ;;  %v4006_v52 = vmul.f32 %v3920_v21, %v3827_v36 }
 0x2e9   :  { %4988 = vst [vmem:[#allocation50_spill] sm:$0xff] %v3952_v28  ;;  %v4002_v28 = vmul.f32 %v3917_v27, %v3827_v36 }
 0x2ea   :  { %4994 = vst [vmem:[#allocation56_spill] sm:$0xff] %v4006_v52  ;;  %v1024_v52 = vmul.f32 %v3631_v24, %v3571_v4 }
 0x2ed   :  { %v3954_v22 = vpop.permute.xlu2 %1356  ;;  %v3956_v49 = vpop.permute.xlu1 %1341 }
 0x2ee   :  { %4989 = vst [vmem:[#allocation51_spill] sm:$0xff] %v3954_v22  ;;  %v4123_v22 = vmul.f32 %v3920_v21, %v3773_v43 }
 0x2ef   :  { %4990 = vst [vmem:[#allocation52_spill] sm:$0xff] %v3956_v49  ;;  %v4085_v49 = vmul.f32 %v3920_v21, %v3737_v32 }
 0x2f0   :  { %5016 = vst [vmem:[#allocation77_spill] sm:$0xff] %v4123_v22  ;;  %v2959_v22 = vld [vmem:[#allocation8 + $0x144] sm:$0xf0] }
 0x2f1   :  { %5010 = vst [vmem:[#allocation71_spill] sm:$0xff] %v4085_v49 }
 0x2f5   :  { %v3984_v30 = vpop.permute.xlu2 %1366  ;;  %1754 = vmax.xlane.f32.xlu1 %v1753_v12  ;;  %v3986_v31 = vpop.permute.xlu1 %1351  ;;  %v1757_v12 = vsel %vm1750_vm0, %v3531_v41, inf  ;;  %vm973_vm0 = vcmp.gt.f32.partialorder %v3644_v29, 0.0 }
 0x2f6   :  { %4993 = vst [vmem:[#allocation55_spill] sm:$0xff] %v3986_v31  ;;  %v1758_v46 = vmin.f32 %v1756_v26, %v1757_v12  ;;  %v4018_v26 = vmul.f32 %v3917_v27, %v3861_v44  ;;  %v4022_v12 = vmul.f32 %v3920_v21, %v3861_v44  ;;  %v4039_v44 = vmul.f32 %v3917_v27, %v3771_v42 }
 0x2f8   :  { %5000 = vst [vmem:[#allocation62_spill] sm:$0xff] %v4039_v44  ;;  %v4093_v44 = vmul.f32 %v3920_v21, %v3843_v19 }
 0x2fa   :  { %5012 = vst [vmem:[#allocation73_spill] sm:$0xff] %v4093_v44  ;;  %v2672_v44 = vld [vmem:[#allocation8 + $0x100] sm:$0xf] }
 0x2fc   :  { %1759 = vmin.xlane.f32.xlu2 %v1758_v46 }
 0x2fd   :  { %v4008_v34 = vpop.permute.xlu2 %1386  ;;  %v4010_v16 = vpop.permute.xlu1 %1361 }
 0x2fe   :  { %4995 = vst [vmem:[#allocation57_spill] sm:$0xff] %v4008_v34 }
 0x2ff   :  { %4996 = vst [vmem:[#allocation58_spill] sm:$0xff] %v4010_v16  ;;  %v2986_v16 = vld [vmem:[#allocation8 + $0x224] sm:$0xf] }
 0x305   :  { %v4024_v36 = vpop.permute.xlu2 %1396  ;;  %v4026_v46 = vpop.permute.xlu1 %1371 }
 0x306   :  { %4997 = vst [vmem:[#allocation59_spill] sm:$0xff] %v4024_v36  ;;  %v4043_v36 = vmul.f32 %v3920_v21, %v3771_v42  ;;  %v4061_v42 = vmul.f32 %v3920_v21, %v3807_v51 }
 0x308   :  { %5001 = vst [vmem:[#allocation63_spill] sm:$0xff] %v4043_v36  ;;  %v5008_v36 = vmov 0  }
 0x309   :  { %5005 = vst [vmem:[#allocation67_spill] sm:$0xff] %v4061_v42 }
 0x30d   :  { %v4032_v34 = vpop.permute.xlu2 %1406  ;;  %v4034_v41 = vpop.permute.xlu1 %1381 }
 0x30e   :  { %4998 = vst [vmem:[#allocation60_spill] sm:$0xff] %v4032_v34  ;;  %1860 = vperm.xlu1 %3028, %v3539_v53   ;;  %v4057_v34 = vmul.f32 %v3917_v27, %v3807_v51  ;;  %v1006_v51 = vmul.f32 %v3629_v23, %v3644_v29 }
 0x30f   :  { %4999 = vst [vmem:[#allocation61_spill] sm:$0xff] %v4034_v41  ;;  %v4089_v41 = vmul.f32 %v3917_v27, %v3843_v19  ;;  %v4131_v19 = vmul.f32 %v3920_v21, %v3879_v48 }
 0x310   :  { %5004 = vst [vmem:[#allocation66_spill] sm:$0xff] %v4057_v34 }
 0x311   :  { %5011 = vst [vmem:[#allocation72_spill] sm:$0xff] %v4089_v41 }
 0x312   :  { %5018 = vst [vmem:[#allocation79_spill] sm:$0xff] %v4131_v19  ;;  %v3004_v19 = vld [vmem:[#allocation8 + $0x2b4] sm:$0xf] }
 0x314   :  { %1864 = vperm.xlu2 %3029, %v3542_v54  }
 0x315   :  { %v4046_v35 = vpop.permute.xlu2 %1416  ;;  %v4048_v50 = vpop.permute.xlu1 %1391 }
 0x316   :  { %5002 = vst [vmem:[#allocation64_spill] sm:$0xff] %v4046_v35  ;;  %1868 = vperm.xlu1 %3028, %v3544_v55   ;;  %v1039_v35 = vmul.f32 %v3631_v24, %v3644_v29 }
 0x317   :  { %5003 = vst [vmem:[#allocation65_spill] sm:$0xff] %v4048_v50 }
 0x318   :  { %v1071_v34 = vsel %vm973_vm0, %v1006_v51, %v1039_v35  ;;  %v1056_v35 = vsel %vm958_vm6, %v991_v33, %v1024_v52  ;;  %v4119_v51 = vmul.f32 %v3917_v27, %v3773_v43 }
 0x31a   :  { %5015 = vst [vmem:[#allocation76_spill] sm:$0xff] %v4119_v51 }
 0x31c   :  { %1872 = vperm.xlu2 %3029, %v3546_v56  }
 0x31d   :  { %v4064_v31 = vpop.permute.xlu2 %1426  ;;  %v4066_v50 = vpop.permute.xlu1 %1401 }
 0x31e   :  { %5006 = vst [vmem:[#allocation68_spill] sm:$0xff] %v4064_v31  ;;  %3030 = vset.pattern.permute.xlu1 %v5008_v36 }
 0x31f   :  { %5007 = vst [vmem:[#allocation69_spill] sm:$0xff] %v4066_v50  ;;  %1150 = vperm.xlu1 %3030, %v3571_v4   ;;  %v4081_v50 = vmul.f32 %v3917_v27, %v3737_v32 }
 0x321   :  { %5009 = vst [vmem:[#allocation70_spill] sm:$0xff] %v4081_v50 }
 0x324   :  { %1880 = vperm.xlu2 %3029, %v3550_v58  }
 0x325   :  { %v4096_v42 = vpop.permute.xlu2 %1436  ;;  %v4098_v31 = vpop.permute.xlu1 %1411 }
 0x326   :  { %5013 = vst [vmem:[#allocation74_spill] sm:$0xff] %v4096_v42  ;;  %v2953_v42 = vld [vmem:[#allocation8 + $0x114] sm:$0xf0] }
 0x327   :  { %5014 = vst [vmem:[#allocation75_spill] sm:$0xff] %v4098_v31  ;;  %1451 = vperm.xlu1 %3030, %v1071_v34   ;;  %v4127_v34 = vmul.f32 %v3917_v27, %v3879_v48  ;;  %v4177_v48 = vmul.f32 %v3920_v21, %v3845_v45  ;;  %v2673_v41 = vor.u32 %v2953_v42, %v2672_v44  ;;  %v3010_v44 = vld [vmem:[#allocation8 + $0x2e4] sm:$0xf]  ;;  %v2914_v42 = vld [vmem:[#allocation8 + $0x2f8] sm:$0xf0] }
 0x329   :  { %5017 = vst [vmem:[#allocation78_spill] sm:$0xff] %v4127_v34  ;;  %v2744_v34 = vld [vmem:[#allocation8 + $0x190] sm:$0xf] }
 0x32a   :  { %5025 = vst [vmem:[#allocation86_spill] sm:$0xff] %v4177_v48  ;;  %v2864_v48 = vld [vmem:[#allocation8 + $0x280] sm:$0xf] }
 0x32c   :  { %3032 = vset.pattern.permute.xlu2 %v5008_v36  ;;  %v4148_v36 = vpop.trf.xlu0 }
 0x32d   :  { %1376 = vperm.xlu2 %3032, %v1056_v35   ;;  %v4134_v33 = vpop.permute.xlu2 %1446  ;;  %v4136_v52 = vpop.permute.xlu1 %1421  ;;  %v4152_v35 = vmul.f32 %v3917_v27, %v3809_v18  ;;  %v1007_v49 = vmul.f32 %v3629_v23, %v4148_v36  ;;  %v1040_v31 = vmul.f32 %v3631_v24, %v4148_v36  ;;  %vm974_vm9 = vcmp.gt.f32.partialorder %v4148_v36, 0.0  ;;  %v2696_v23 = vld [vmem:[#allocation8 + $0x130] sm:$0xf] }
 0x32e   :  { %5019 = vst [vmem:[#allocation80_spill] sm:$0xff] %v4134_v33  ;;  %v4173_v18 = vmul.f32 %v3917_v27, %v3845_v45  ;;  %v2965_v45 = vld [vmem:[#allocation8 + $0x174] sm:$0xf0]  ;;  %v2697_v51 = vor.u32 %v2959_v22, %v2696_v23 }
 0x32f   :  { %5020 = vst [vmem:[#allocation81_spill] sm:$0xff] %v4136_v52  ;;  %3031 = vset.pattern.permute.xlu1 %v4976_v47  ;;  %v1072_v32 = vsel %vm974_vm9, %v1007_v49, %v1040_v31  ;;  %v2720_v49 = vld [vmem:[#allocation8 + $0x160] sm:$0xf]  ;;  %v2888_v52 = vld [vmem:[#allocation8 + $0x2b0] sm:$0xf] }
 0x330   :  { %1876 = vperm.xlu1 %3031, %v3548_v57   ;;  %5021 = vst [vmem:[#allocation82_spill] sm:$0xff] %v4152_v35  ;;  %v2912_v31 = vld [vmem:[#allocation8 + $0x2e0] sm:$0xf] }
 0x331   :  { %5024 = vst [vmem:[#allocation85_spill] sm:$0xff] %v4173_v18 }
 0x335   :  { %v4158_v43 = vpop.permute.xlu1 %1431  ;;  %1230 = vperm.xlu2 %3032, %v4148_v36  }
 0x336   :  { %5023 = vst [vmem:[#allocation84_spill] sm:$0xff] %v4158_v43  ;;  %v2889_v43 = vor.u32 %v3007_v13, %v2888_v52  ;;  %v2995_v13 = vld [vmem:[#allocation8 + $0x264] sm:$0xf0]  ;;  %v2722_v52 = vld [vmem:[#allocation8 + $0x178] sm:$0xf0] }
 0x338   :  { %1884 = vperm.xlu1 %3031, %v3552_v59  }
 0x33d   :  { %v4181_v50 = vpop.permute.xlu1 %1441  ;;  %1456 = vperm.xlu2 %3032, %v1072_v32   ;;  %v3013_v32 = vld [vmem:[#allocation8 + $0x2f4] sm:$0xf0] }
 0x33e   :  { %5026 = vst [vmem:[#allocation87_spill] sm:$0xff] %v4181_v50  ;;  %v2913_v24 = vor.u32 %v3013_v32, %v2912_v31  ;;  %v2648_v31 = vld [vmem:[#allocation8 + $0xd0] sm:$0xf] }
 0x33f   :  { %v2840_v32 = vld [vmem:[#allocation8 + $0x250] sm:$0xf] }
 0x340   :  { %1892 = vperm.xlu1 %3031, %v3556_v61   ;;  %829 = vmatpush.bf16.msra.mxu1 %v2913_v24  ;;  %v2841_v23 = vor.u32 %v2995_v13, %v2840_v32  ;;  %v2624_v32 = vld [vmem:[#allocation8 + $0xa0] sm:$0xf] }
 0x341   :  { %v2816_v13 = vld [vmem:[#allocation8 + $0x220] sm:$0xf] }
 0x344   :  { %830 = vmatpush.bf16.msra.mxu1 %v2889_v43 }
 0x345   :  { %3033 = vset.pattern.permute.xlu2 %v4976_v47  ;;  %v2721_v47 = vor.u32 %v2965_v45, %v2720_v49  ;;  %v3001_v49 = vld [vmem:[#allocation8 + $0x294] sm:$0xf0] }
 0x346   :  { %1888 = vperm.xlu2 %3033, %v3554_v60   ;;  %v2865_v24 = vor.u32 %v3001_v49, %v2864_v48 }
 0x347   :  { %816 = vmatpush.bf16.msra.mxu0 %v2721_v47  ;;  %v2947_v47 = vld [vmem:[#allocation8 + $0xe4] sm:$0xf0] }
 0x348   :  { %1900 = vperm.xlu1 %3031, %v3561_v63   ;;  %831 = vmatpush.bf16.msra.mxu1 %v2865_v24  ;;  %v2649_v22 = vor.u32 %v2947_v47, %v2648_v31 }
 0x34b   :  { %817 = vmatpush.bf16.msra.mxu0 %v2697_v51  ;;  %v2962_v51 = vld [vmem:[#allocation8 + $0x164] sm:$0xf] }
 0x34c   :  { %v2725_v50 = vor.u32 %v2962_v51, %v2722_v52  ;;  %832 = vmatpush.bf16.msra.mxu1 %v2841_v23  ;;  %v2890_v23 = vld [vmem:[#allocation8 + $0x2c8] sm:$0xf0] }
 0x34e   :  { %1896 = vperm.xlu2 %3033, %v3559_v62   ;;  %842 = vmatpush.bf16.msra.mxu2 %v2725_v50 }
 0x34f   :  { %818 = vmatpush.bf16.msra.mxu0 %v2673_v41  ;;  %v2917_v41 = vor.u32 %v3010_v44, %v2914_v42  ;;  %v2956_v44 = vld [vmem:[#allocation8 + $0x134] sm:$0xf]  ;;  %v2698_v42 = vld [vmem:[#allocation8 + $0x148] sm:$0xf0] }
 0x350   :  { %1912 = vperm.xlu1 %3031, %v3567_v2  }
 0x351   :  { %855 = vmatpush.bf16.msra.mxu3 %v2917_v41 }
 0x353   :  { %819 = vmatpush.bf16.msra.mxu0 %v2649_v22  ;;  %v2941_v22 = vld [vmem:[#allocation8 + $0xb4] sm:$0xf0] }
 0x354   :  { %v2625_v41 = vor.u32 %v2941_v22, %v2624_v32  ;;  %v2950_v32 = vld [vmem:[#allocation8 + $0x104] sm:$0xf]  ;;  %v2674_v22 = vld [vmem:[#allocation8 + $0x118] sm:$0xf0] }
 0x356   :  { %1908 = vperm.xlu2 %3033, %v3565_v1  }
 0x357   :  { %820 = vmatpush.bf16.msra.mxu0 %v2625_v41 }
 0x358   :  { %1920 = vperm.xlu1 %3031, %v3571_v4  }
 0x35e   :  { %1916 = vperm.xlu2 %3033, %v3569_v3  }
 0x360   :  { %1932 = vperm.xlu1 %3031, %v3580_v7  }
 0x366   :  { %1928 = vperm.xlu2 %3033, %v3576_v6  }
 0x368   :  { %v1755_v35 = vpop.xlane.xlu1 %1754 }
 0x369   :  { %v4198_v45 = vperm.slane %v1755_v35, 3 }
 0x36b   :  { %v1777_v48 = vmul.f32 %v4198_v45, %v3571_v4  ;;  %v1793_v35 = vmul.f32 %v4198_v45, %v4148_v36  ;;  %v1792_v31 = vmul.f32 %v4198_v45, %v3644_v29 }
 0x36e   :  { %1984 = vperm.xlu2 %3033, %v4148_v36  }
 0x36f   :  { %v1760_v43 = vpop.xlane.xlu2 %1759 }
 0x370   :  { %v4201_v18 = vperm.slane %v1760_v43, 3  ;;  %v2989_v43 = vld [vmem:[#allocation8 + $0x234] sm:$0xf0] }
 0x371   :  { %v2817_v61 = vor.u32 %v2989_v43, %v2816_v13  ;;  %v1791_v13 = vmul.f32 %v4198_v45, %v3633_v25  ;;  %v1775_v43 = vmul.f32 %v4198_v45, %v3567_v2 }
 0x372   :  { %v1810_v49 = vmul.f32 %v4201_v18, %v3571_v4  ;;  %v1826_v24 = vmul.f32 %v4201_v18, %v4148_v36  ;;  %v1825_v47 = vmul.f32 %v4201_v18, %v3644_v29  ;;  %v2701_v4 = vor.u32 %v2956_v44, %v2698_v42  ;;  %v2600_v29 = vld [vmem:[#allocation8 + $0x70] sm:$0xf] }
 0x373   :  { %v1809_v36 = vmul.f32 %v4201_v18, %v3569_v3  ;;  %833 = vmatpush.bf16.msra.mxu1 %v2817_v61  ;;  %v2677_v61 = vor.u32 %v2950_v32, %v2674_v22  ;;  %v1790_v44 = vmul.f32 %v4198_v45, %v3623_v20  ;;  %v2977_v32 = vld [vmem:[#allocation8 + $0x1d4] sm:$0xf0]  ;;  %v2944_v22 = vld [vmem:[#allocation8 + $0xd4] sm:$0xf] }
 0x374   :  { %v1842_v50 = vsel %vm958_vm6, %v1777_v48, %v1810_v49  ;;  %v1858_v51 = vsel %vm974_vm9, %v1793_v35, %v1826_v24  ;;  %v1857_v52 = vsel %vm973_vm0, %v1792_v31, %v1825_v47  ;;  %v2893_v48 = vor.u32 %v3004_v19, %v2890_v23  ;;  %v2935_v35 = vld [vmem:[#allocation8 + $0x84] sm:$0xf0]  ;;  %v2792_v49 = vld [vmem:[#allocation8 + $0x1f0] sm:$0xf]  ;;  %843 = vmatpush.bf16.msra.mxu2 %v2701_v4 }
 0x375   :  { %2130 = vperm.xlu0 %3034, %v1842_v50   ;;  %2210 = vperm.xlu1 %3031, %v1858_v51   ;;  %v1824_v24 = vmul.f32 %v4201_v18, %v3633_v25  ;;  %v2601_v31 = vor.u32 %v2935_v35, %v2600_v29  ;;  %v2983_v47 = vld [vmem:[#allocation8 + $0x204] sm:$0xf0]  ;;  %v1776_v19 = vmul.f32 %v4198_v45, %v3569_v3  ;;  %v2998_v51 = vld [vmem:[#allocation8 + $0x284] sm:$0xf]  ;;  %v2929_v29 = vld [vmem:[#allocation8 + $0x54] sm:$0xf0] }
 0x376   :  { %2205 = vperm.xlu2 %3033, %v1857_v52   ;;  %856 = vmatpush.bf16.msra.mxu3 %v2893_v48  ;;  %v2793_v50 = vor.u32 %v2983_v47, %v2792_v49  ;;  %v2866_v52 = vld [vmem:[#allocation8 + $0x298] sm:$0xf0]  ;;  %v1769_v23 = vmul.f32 %v4198_v45, %v3554_v60  ;;  %v1808_v4 = vmul.f32 %v4201_v18, %v3567_v2  ;;  %v2576_v48 = vld [vmem:[#allocation8 + $0x40] sm:$0xf]  ;;  %vm5033_vm6 = vcmp.gt.f32.partialorder %v3580_v7, 0.0 }
 0x377   :  { %v4221_v33 = vpop.permute.xlu2 %1864  ;;  %v2869_v42 = vor.u32 %v2998_v51, %v2866_v52  ;;  %v1841_v41 = vsel %vm957_vm1, %v1776_v19, %v1809_v36  ;;  %821 = vmatpush.bf16.msra.mxu0 %v2601_v31  ;;  %v2768_v35 = vld [vmem:[#allocation8 + $0x1c0] sm:$0xf]  ;;  %v1784_v49 = vmul.f32 %v4198_v45, %v3595_v11  ;;  %v1856_v47 = vsel %vm972_vm13, %v1791_v13, %v1824_v24  ;;  %v2650_v31 = vld [vmem:[#allocation8 + $0xe8] sm:$0xf0]  ;;  %v2992_v51 = vld [vmem:[#allocation8 + $0x254] sm:$0xf] }
 0x378   :  { %5027 = vst [vmem:[#allocation88_spill] sm:$0xff] %v4221_v33  ;;  %834 = vmatpush.bf16.msra.mxu1 %v2793_v50  ;;  %v1823_v3 = vmul.f32 %v4201_v18, %v3623_v20  ;;  %v2577_v36 = vor.u32 %v2929_v29, %v2576_v48  ;;  %844 = vmatpush.bf16.msra.mxu2 %v2677_v61  ;;  %v2842_v52 = vld [vmem:[#allocation8 + $0x268] sm:$0xf0]  ;;  %v2552_v24 = vld [vmem:[#allocation8 + $0x10] sm:$0xf]  ;;  %vm5036_vm9 = vcmp.gt.f32.partialorder %v3542_v54, 0.0 }
 0x379   :  { %v2769_v19 = vor.u32 %v2977_v32, %v2768_v35  ;;  %v2653_v50 = vor.u32 %v2944_v22, %v2650_v31  ;;  %v2923_v13 = vld [vmem:[#allocation8 + $0x24] sm:$0xf0]  ;;  %v1802_v48 = vmul.f32 %v4201_v18, %v3554_v60  ;;  %v1817_v61 = vmul.f32 %v4201_v18, %v3595_v11  ;;  %v2938_v31 = vld [vmem:[#allocation8 + $0xa4] sm:$0xf]  ;;  %v2818_v2 = vld [vmem:[#allocation8 + $0x238] sm:$0xf0] }
 0x37a   :  { %857 = vmatpush.bf16.msra.mxu3 %v2869_v42  ;;  %v1783_v29 = vmul.f32 %v4198_v45, %v3591_v10  ;;  %v1807_v42 = vmul.f32 %v4201_v18, %v3565_v1  ;;  %v2553_v32 = vor.u32 %v2923_v13, %v2552_v24  ;;  %v2971_v22 = vld [vmem:[#allocation8 + $0x1a4] sm:$0xf0]  ;;  %v1782_v60 = vmul.f32 %v4198_v45, %v3588_v9  ;;  %v2980_v24 = vld [vmem:[#allocation8 + $0x1f4] sm:$0xf] }
 0x37b   :  { %822 = vmatpush.bf16.msra.mxu0 %v2577_v36  ;;  %v2745_v62 = vor.u32 %v2971_v22, %v2744_v34  ;;  %v4274_v36 = vsel %vm965_vm5, %v1784_v49, %v1817_v61  ;;  %v1816_v34 = vmul.f32 %v4201_v18, %v3591_v10  ;;  %v1815_v49 = vmul.f32 %v4201_v18, %v3588_v9  ;;  %v2926_v61 = vld [vmem:[#allocation8 + $0x44] sm:$0xf] }
 0x37c   :  { %835 = vmatpush.bf16.msra.mxu1 %v2769_v19  ;;  %845 = vmatpush.bf16.msra.mxu2 %v2653_v50  ;;  %v1765_v19 = vmul.f32 %v4198_v45, %v3546_v56  ;;  %v2932_v50 = vld [vmem:[#allocation8 + $0x74] sm:$0xf]  ;;  %vm5032_vm5 = vcmp.gt.f32.partialorder %v3573_v5, 0.0  ;;  %vm5043_vm13 = vcmp.gt.f32.partialorder %v3561_v63, 0.0 }
 0x37d   :  { %2125 = vperm.xlu0 %3034, %v1841_v41   ;;  %1976 = vperm.xlu1 %3031, %v3633_v25   ;;  %v1768_v41 = vmul.f32 %v4198_v45, %v3552_v59  ;;  %v2845_v25 = vor.u32 %v2992_v51, %v2842_v52  ;;  %v2626_v51 = vld [vmem:[#allocation8 + $0xb8] sm:$0xf0]  ;;  %v1855_v52 = vsel %vm971_vm10, %v1790_v44, %v1823_v3  ;;  %vm5037_vm10 = vcmp.gt.f32.partialorder %v3539_v53, 0.0 }
 0x37e   :  { %2200 = vperm.xlu2 %3033, %v1856_v47   ;;  %v1840_v47 = vsel %vm956_vm2, %v1775_v43, %v1808_v4  ;;  %v2821_v43 = vor.u32 %v2986_v16, %v2818_v2  ;;  %v4270_v4 = vsel %vm950_vm11, %v1769_v23, %v1802_v48  ;;  %v1801_v44 = vmul.f32 %v4201_v18, %v3552_v59  ;;  %v2794_v48 = vld [vmem:[#allocation8 + $0x208] sm:$0xf0] }
 0x37f   :  { %v4250_v33 = vpop.permute.xlu2 %1872  ;;  %858 = vmatpush.bf16.msra.mxu3 %v2845_v25  ;;  %v1781_v3 = vmul.f32 %v4198_v45, %v3584_v8  ;;  %v1814_v16 = vmul.f32 %v4201_v18, %v3584_v8  ;;  %823 = vmatpush.bf16.msra.mxu0 %v2553_v32  ;;  %v2602_v25 = vld [vmem:[#allocation8 + $0x88] sm:$0xf0]  ;;  %v4297_v13 = vsel %vm964_vm3, %v1783_v29, %v1816_v34  ;;  %vm5030_vm3 = vcmp.gt.f32.partialorder %v3550_v58, 0.0 }
 0x380   :  { %5028 = vst [vmem:[#allocation89_spill] sm:$0xff] %v4250_v33  ;;  %v4258_v35 = vpop.permute.xlu1 %1860  ;;  %v1822_v33 = vmul.f32 %v4201_v18, %v3617_v17  ;;  %836 = vmatpush.bf16.msra.mxu1 %v2745_v62  ;;  %v4288_v23 = vsel %vm949_vm8, %v1768_v41, %v1801_v44  ;;  %v1798_v62 = vmul.f32 %v4201_v18, %v3546_v56  ;;  %v2920_v44 = vld [vmem:[#allocation8 + $0x14] sm:$0xf]  ;;  %v2554_v34 = vld [vmem:[#allocation8 + $0x28] sm:$0xf0]  ;;  %vm5035_vm8 = vcmp.gt.f32.partialorder %v3544_v55, 0.0 }
 0x381   :  { %5029 = vst [vmem:[#allocation90_spill] sm:$0xff] %v4258_v35  ;;  %v2629_v35 = vor.u32 %v2938_v31, %v2626_v51  ;;  %v4301_v59 = vsel %vm962_vm12, %v1781_v3, %v1814_v16  ;;  %v1774_v41 = vmul.f32 %v4198_v45, %v3565_v1  ;;  %v4309_v29 = vsel %vm963_vm15, %v1782_v60, %v1815_v49  ;;  %v2974_v31 = vld [vmem:[#allocation8 + $0x1c4] sm:$0xf]  ;;  %v2770_v51 = vld [vmem:[#allocation8 + $0x1d8] sm:$0xf0] }
 0x382   :  { %v1789_v8 = vmul.f32 %v4198_v45, %v3617_v17  ;;  %v2797_v22 = vor.u32 %v2980_v24, %v2794_v48  ;;  %824 = vmatmul.bf16.vlgmr.msra.gmra.mxu0 %v3517_v37  ;;  %v1800_v3 = vmul.f32 %v4201_v18, %v3550_v58  ;;  %v2773_v60 = vor.u32 %v2974_v31, %v2770_v51 }
 0x383   :  { %846 = vmatpush.bf16.msra.mxu2 %v2629_v35  ;;  %859 = vmatpush.bf16.msra.mxu3 %v2821_v43  ;;  %v4318_v35 = vsel %vm946_vm7, %v1765_v19, %v1798_v62  ;;  %v1839_v2 = vsel %vm955_vm14, %v1774_v41, %v1807_v42  ;;  %v1767_v43 = vmul.f32 %v4198_v45, %v3550_v58  ;;  %v2968_v62 = vld [vmem:[#allocation8 + $0x194] sm:$0xf]  ;;  %v2746_v41 = vld [vmem:[#allocation8 + $0x1a8] sm:$0xf0]  ;;  %vm5034_vm7 = vcmp.gt.f32.partialorder %v3576_v6, 0.0 }
 0x384   :  { %837 = vmatmul.bf16.vlgmr.msra.gmra.mxu1 %v3519_v38  ;;  %v1854_v56 = vsel %vm970_vm4, %v1789_v8, %v1822_v33  ;;  %v2557_v49 = vor.u32 %v2920_v44, %v2554_v34  ;;  %v1766_v42 = vmul.f32 %v4198_v45, %v3548_v57  ;;  %v1799_v19 = vmul.f32 %v4201_v18, %v3548_v57 }
 0x385   :  { %2120 = vperm.xlu0 %3034, %v1840_v47   ;;  %1972 = vperm.xlu1 %3031, %v3623_v20   ;;  %v2605_v20 = vor.u32 %v2932_v50, %v2602_v25  ;;  %v2578_v47 = vld [vmem:[#allocation8 + $0x58] sm:$0xf0]  ;;  %v4333_v1 = vsel %vm5030_vm3, %v1767_v43, %v1800_v3  ;;  %v1778_v50 = vmul.f32 %v4198_v45, %v3573_v5  ;;  %vm5031_vm4 = vcmp.gt.f32.partialorder %v3548_v57, 0.0 }
 0x386   :  { %2195 = vperm.xlu2 %3033, %v1855_v52   ;;  %v2581_v16 = vor.u32 %v2926_v61, %v2578_v47  ;;  %v1811_v33 = vmul.f32 %v4201_v18, %v3573_v5  ;;  %v1780_v25 = vmul.f32 %v4198_v45, %v3580_v7  ;;  %v1813_v58 = vmul.f32 %v4201_v18, %v3580_v7 }
 0x387   :  { %v4311_v32 = vpop.permute.xlu2 %1880  ;;  %847 = vmatpush.bf16.msra.mxu2 %v2605_v20  ;;  %860 = vmatpush.bf16.msra.mxu3 %v2797_v22  ;;  %v1779_v24 = vmul.f32 %v4198_v45, %v3576_v6  ;;  %v4351_v20 = vsel %vm5031_vm4, %v1766_v42, %v1799_v19  ;;  %v1812_v48 = vmul.f32 %v4201_v18, %v3576_v6  ;;  %vm5038_vm11 = vcmp.gt.f32.partialorder %v3563_v0, 0.0 }
 0x388   :  { %v4320_v52 = vpop.permute.xlu1 %1868  ;;  %v1764_v61 = vmul.f32 %v4198_v45, %v3544_v55  ;;  %v1797_v47 = vmul.f32 %v4201_v18, %v3544_v55  ;;  %v4362_v8 = vsel %vm5032_vm5, %v1778_v50, %v1811_v33  ;;  %v4366_v57 = vsel %vm5033_vm6, %v1780_v25, %v1813_v58 }
 0x389   :  { %v1763_v22 = vmul.f32 %v4198_v45, %v3542_v54  ;;  %v4372_v31 = vsel %vm5034_vm7, %v1779_v24, %v1812_v48  ;;  %v1796_v5 = vmul.f32 %v4201_v18, %v3542_v54  ;;  %v2749_v7 = vor.u32 %v2968_v62, %v2746_v41  ;;  %v1226_v48 = vpop.permute.xlu0 %1225 }
 0x38a   :  { %v1795_v44 = vmul.f32 %v4201_v18, %v3539_v53  ;;  %v1806_v6 = vmul.f32 %v4201_v18, %v3563_v0  ;;  %v1821_v43 = vmul.f32 %v4201_v18, %v3611_v15  ;;  %v1788_v54 = vmul.f32 %v4198_v45, %v3611_v15 }
 0x38b   :  { %848 = vmatpush.bf16.msra.mxu2 %v2581_v16  ;;  %861 = vmatpush.bf16.msra.mxu3 %v2773_v60  ;;  %v4388_v55 = vsel %vm5036_vm9, %v1763_v22, %v1796_v5  ;;  %v1773_v60 = vmul.f32 %v4198_v45, %v3563_v0  ;;  %vm5039_vm12 = vcmp.gt.f32.partialorder %v3611_v15, 0.0  ;;  %v5040_v58 = vsub.f32 %v4018_v26, %v4026_v46 }
 0x38c   :  { %v1805_v0 = vmul.f32 %v4201_v18, %v3561_v63  ;;  %v5042_v26 = vsub.f32 %v3979_v40, %v3984_v30  ;;  %vm5045_vm14 = vcmp.gt.f32.partialorder %v3607_v14, 0.0  ;;  %vm1657_vm3 = vcmask 1040384  }
 0x38d   :  { %2115 = vperm.xlu0 %3034, %v1839_v2   ;;  %1968 = vperm.xlu1 %3031, %v3617_v17   ;;  %v4376_v17 = vsel %vm5035_vm8, %v1764_v61, %v1797_v47  ;;  %v1762_v2 = vmul.f32 %v4198_v45, %v3539_v53  ;;  %v1838_v50 = vsel %vm5038_vm11, %v1773_v60, %v1806_v6  ;;  %v1579_v24 = vmul.f32 1.442695, %v5040_v58 }
 0x38e   :  { %2190 = vperm.xlu2 %3033, %v1854_v56   ;;  %v1853_v53 = vsel %vm5039_vm12, %v1788_v54, %v1821_v43  ;;  %v1575_v61 = vmul.f32 1.442695, %v5042_v26  ;;  %v1787_v47 = vmul.f32 %v4198_v45, %v3607_v14  ;;  %v5050_v54 = vld [vmem:[#allocation19_spill] sm:$0xff]  ;;  %vm5151_vm4 = vcmask 1041408  }
 0x38f   :  { %v1377_v51 = vpop.permute.xlu2 %1376  ;;  %v4394_v3 = vsel %vm5037_vm10, %v1762_v2, %v1795_v44  ;;  %849 = vmatpush.bf16.msra.mxu2 %v2557_v49  ;;  %862 = vmatpush.bf16.msra.mxu3 %v2749_v7  ;;  %v5046_v7 = vld [vmem:[#allocation58_spill] sm:$0xff]  ;;  %vm5057_vm15 = vcmp.gt.f32.partialorder %v5050_v54, 0.0 }
 0x390   :  { %v5047_v2 = vsub.f32 %v4002_v28, %v5046_v7 }
 0x391   :  { %v1151_v34 = vpop.permute.xlu1 %1150 }
 0x392   :  { %v1265_v56 = vmul.f32 %v3917_v27, %v1151_v34  ;;  %v1266_v16 = vmul.f32 %v3920_v21, %v1151_v34  ;;  %850 = vmatmul.bf16.vlgmr.msra.gmra.mxu2 %v3517_v37  ;;  %863 = vmatmul.bf16.vlgmr.msra.gmra.mxu3 %v3519_v38  ;;  %v1820_v37 = vmul.f32 %v4201_v18, %v3607_v14  ;;  %v1571_v44 = vmul.f32 1.442695, %v5047_v2  ;;  %v5048_v34 = vld [vmem:[#allocation56_spill] sm:$0xff] }
 0x393   :  { %v1772_v38 = vmul.f32 %v4198_v45, %v3561_v63 }
 0x394   :  { %v1489_v42 = vsub.f32 %v1265_v56, %v1377_v51  ;;  %v1490_v19 = vsub.f32 %v1266_v16, %v1377_v51  ;;  %v1852_v5 = vsel %vm5045_vm14, %v1787_v47, %v1820_v37  ;;  %v1295_v51 = vmul.f32 %v3917_v27, %v1226_v48 }
 0x395   :  { %2110 = vperm.xlu0 %3034, %v1838_v50   ;;  %1964 = vperm.xlu1 %3031, %v3611_v15   ;;  %v5041_v15 = vsub.f32 %v4022_v12, %v4026_v46  ;;  %v1837_v12 = vsel %vm5043_vm13, %v1772_v38, %v1805_v0  ;;  %v5044_v46 = vsub.f32 %v3982_v39, %v3984_v30  ;;  %v5052_v50 = vld [vmem:[#allocation51_spill] sm:$0xff]  ;;  %v5055_v38 = vld [vmem:[#allocation50_spill] sm:$0xff] }
 0x396   :  { %v1583_v33 = vmul.f32 1.442695, %v1489_v42  ;;  %v1585_v25 = vmul.f32 1.442695, %v1490_v19  ;;  %2185 = vperm.xlu2 %3033, %v1853_v53   ;;  %v1296_v39 = vmul.f32 %v3920_v21, %v1226_v48  ;;  %v1804_v42 = vmul.f32 %v4201_v18, %v5050_v54  ;;  %v5051_v19 = vld [vmem:[#allocation49_spill] sm:$0xff] }
 0x397   :  { %v1231_v49 = vpop.permute.xlu2 %1230  ;;  %v1581_v62 = vmul.f32 1.442695, %v5041_v15  ;;  %v1577_v22 = vmul.f32 1.442695, %v5044_v46  ;;  %v5053_v53 = vsub.f32 %v5051_v19, %v5052_v50  ;;  %v5056_v48 = vsub.f32 %v5055_v38, %v5052_v50 }
 0x398   :  { %3035 = vpow2.f32 %v1583_v33  ;;  %v1297_v63 = vmul.f32 %v3917_v27, %v1231_v49  ;;  %v1298_v6 = vmul.f32 %v3920_v21, %v1231_v49  ;;  %v5054_v49 = vld [vmem:[#allocation21_spill] sm:$0xff] }
 0x399   :  { %3037 = vpow2.f32 %v1585_v25  ;;  %v1452_v41 = vpop.permute.xlu1 %1451  ;;  %v1567_v33 = vmul.f32 1.442695, %v5053_v53  ;;  %v1819_v58 = vmul.f32 %v4201_v18, %v5054_v49  ;;  %v1569_v26 = vmul.f32 1.442695, %v5056_v48  ;;  %v5070_v53 = vld [vmem:[#allocation20_spill] sm:$0xff] }
 0x39a   :  { %3039 = vpow2.f32 %v1579_v24  ;;  %v1519_v16 = vsub.f32 %v1295_v51, %v1452_v41  ;;  %v1520_v25 = vsub.f32 %v1296_v39, %v1452_v41  ;;  %v1786_v41 = vmul.f32 %v4198_v45, %v5054_v49  ;;  %v5060_v51 = vld [vmem:[#allocation55_spill] sm:$0xff] }
 0x39b   :  { %3041 = vpow2.f32 %v1581_v62  ;;  %v1771_v62 = vmul.f32 %v4198_v45, %v5050_v54  ;;  %vm5058_vm1 = vcmp.gt.f32.partialorder %v5054_v49, 0.0  ;;  %vm5083_vm0 = vcmp.gt.f32.partialorder %v5070_v53, 0.0 }
 0x39c   :  { %3043 = vpow2.f32 %v1575_v61  ;;  %v1643_v47 = vmul.f32 1.442695, %v1519_v16 }
 0x39d   :  { %2105 = vperm.xlu0 %3034, %v1837_v12   ;;  %1960 = vperm.xlu1 %3031, %v3607_v14   ;;  %v5049_v14 = vsub.f32 %v5048_v34, %v5046_v7  ;;  %3045 = vpow2.f32 %v1577_v22  ;;  %v1836_v12 = vsel %vm5057_vm15, %v1771_v62, %v1804_v42  ;;  %v1645_v22 = vmul.f32 1.442695, %v1520_v25  ;;  %v5068_v42 = vld [vmem:[#allocation79_spill] sm:$0xff] }
 0x39e   :  { %v3036_v40 = vpop.eup %3035  ;;  %2180 = vperm.xlu2 %3033, %v1852_v5   ;;  %3047 = vpow2.f32 %v1571_v44  ;;  %v1851_v5 = vsel %vm5058_vm1, %v1786_v41, %v1819_v58  ;;  %v5072_v58 = vld [vmem:[#allocation45_spill] sm:$0xff]  ;;  %v5076_v41 = vld [vmem:[#allocation35_spill] sm:$0xff] }
 0x39f   :  { %v3038_v30 = vpop.eup %3037  ;;  %v1573_v43 = vmul.f32 1.442695, %v5049_v14  ;;  %1660 = vmatpush.xpose.msrb.mxu0 %v3036_v40  ;;  %v1457_v56 = vpop.permute.xlu2 %1456  ;;  %v5059_v40 = vld [vmem:[#allocation53_spill] sm:$0xff]  ;;  %v5064_v14 = vld [vmem:[#allocation78_spill] sm:$0xff] }
 0x3a0   :  { %1680 = vmatpush.xpose.msrb.mxu1 %v3038_v30  ;;  %v1521_v60 = vsub.f32 %v1297_v63, %v1457_v56  ;;  %v1522_v28 = vsub.f32 %v1298_v6, %v1457_v56  ;;  %v3040_v24 = vpop.eup %3039  ;;  %v5061_v7 = vsub.f32 %v5059_v40, %v5060_v51  ;;  %v5062_v63 = vld [vmem:[#allocation54_spill] sm:$0xff] }
 0x3a1   :  { %v3042_v37 = vpop.eup %3041  ;;  %3049 = vpow2.f32 %v1573_v43  ;;  %v5063_v6 = vsub.f32 %v5062_v63, %v5060_v51  ;;  %v5065_v43 = vld [vmem:[#allocation80_spill] sm:$0xff] }
 0x3a2   :  { %v1647_v0 = vmul.f32 1.442695, %v1521_v60  ;;  %v1649_v15 = vmul.f32 1.442695, %v1522_v28  ;;  %v4456_v61 = vpop.permute.xlu1 %1876  ;;  %v3044_v46 = vpop.eup %3043  ;;  %v1563_v2 = vmul.f32 1.442695, %v5061_v7  ;;  %v5066_v56 = vsub.f32 %v5064_v14, %v5065_v43 }
 0x3a3   :  { %1661 = vmatpush.xpose.msrb.mxu0 %v3040_v24  ;;  %v3046_v44 = vpop.eup %3045  ;;  %v1565_v30 = vmul.f32 1.442695, %v5063_v6  ;;  %v5067_v60 = vld [vmem:[#allocation18_spill] sm:$0xff]  ;;  %v5069_v19 = vsub.f32 %v5068_v42, %v5065_v43  ;;  %v1250_v7 = vmul.f32 %v3920_v21, %v5076_v41  ;;  %v5085_v43 = vld [vmem:[#allocation47_spill] sm:$0xff]  ;;  %v5088_v42 = vld [vmem:[#allocation48_spill] sm:$0xff] }
 0x3a4   :  { %3051 = vpow2.f32 %v1647_v0  ;;  %1681 = vmatpush.xpose.msrb.mxu1 %v3042_v37  ;;  %v3048_v34 = vpop.eup %3047  ;;  %v1639_v16 = vmul.f32 1.442695, %v5066_v56  ;;  %v1803_v28 = vmul.f32 %v4201_v18, %v5067_v60  ;;  %v5074_v37 = vld [vmem:[#allocation44_spill] sm:$0xff]  ;;  %vm5080_vm2 = vcmp.gt.f32.partialorder %v5067_v60, 0.0 }
 0x3a5   :  { %3053 = vpow2.f32 %v1649_v15  ;;  %2100 = vperm.xlu0 %3034, %v1836_v12   ;;  %1956 = vperm.xlu1 %3031, %v5054_v49   ;;  %v1641_v50 = vmul.f32 1.442695, %v5069_v19  ;;  %v5071_v49 = vld [vmem:[#allocation43_spill] sm:$0xff]  ;;  %v1770_v15 = vmul.f32 %v4198_v45, %v5067_v60  ;;  %v5075_v38 = vsub.f32 %v5074_v37, %v5072_v58  ;;  %v5077_v12 = vld [vmem:[#allocation85_spill] sm:$0xff]  ;;  %v5086_v56 = vld [vmem:[#allocation52_spill] sm:$0xff] }
 0x3a6   :  { %3055 = vpow2.f32 %v1567_v33  ;;  %2175 = vperm.xlu2 %3033, %v1851_v5   ;;  %v1818_v33 = vmul.f32 %v4201_v18, %v5070_v53  ;;  %v5073_v24 = vsub.f32 %v5071_v49, %v5072_v58  ;;  %v1785_v18 = vmul.f32 %v4198_v45, %v5070_v53  ;;  %v5081_v45 = vld [vmem:[#allocation86_spill] sm:$0xff]  ;;  %v5091_v58 = vld [vmem:[#allocation72_spill] sm:$0xff] }
 0x3a7   :  { %3057 = vpow2.f32 %v1569_v26  ;;  %1662 = vmatpush.xpose.msrb.mxu0 %v3044_v46  ;;  %v4471_v39 = vpop.permute.xlu2 %1888  ;;  %v3050_v54 = vpop.eup %3049  ;;  %v1561_v48 = vmul.f32 1.442695, %v5075_v38  ;;  %v5078_v46 = vld [vmem:[#allocation87_spill] sm:$0xff]  ;;  %v1835_v40 = vsel %vm5080_vm2, %v1770_v15, %v1803_v28  ;;  %v5089_v19 = vsub.f32 %v5088_v42, %v5086_v56  ;;  %v5094_v38 = vld [vmem:[#allocation73_spill] sm:$0xff] }
 0x3a8   :  { %3059 = vpow2.f32 %v1643_v47  ;;  %1682 = vmatpush.xpose.msrb.mxu1 %v3046_v44  ;;  %v1559_v0 = vmul.f32 1.442695, %v5073_v24  ;;  %v1249_v47 = vmul.f32 %v3917_v27, %v5076_v41  ;;  %v1850_v6 = vsel %vm5083_vm0, %v1785_v18, %v1818_v33  ;;  %v5092_v24 = vld [vmem:[#allocation74_spill] sm:$0xff] }
 0x3a9   :  { %3061 = vpow2.f32 %v1645_v22  ;;  %v5079_v22 = vsub.f32 %v5077_v12, %v5078_v46 }
 0x3aa   :  { %v3052_v25 = vpop.eup %3051  ;;  %3063 = vpow2.f32 %v1563_v2  ;;  %v5082_v2 = vsub.f32 %v5081_v45, %v5078_v46  ;;  %v4505_v63 = vpop.permute.xlu1 %1884  ;;  %v5098_v45 = vld [vmem:[#allocation82_spill] sm:$0xff] }
 0x3ab   :  { %v3054_v62 = vpop.eup %3053  ;;  %3065 = vpow2.f32 %v1565_v30  ;;  %1663 = vmatpush.xpose.msrb.mxu0 %v3048_v34  ;;  %1700 = vmatpush.xpose.msrb.mxu2 %v3052_v25  ;;  %v1635_v5 = vmul.f32 1.442695, %v5079_v22  ;;  %v5084_v34 = vld [vmem:[#allocation41_spill] sm:$0xff] }
 0x3ac   :  { %v3056_v26 = vpop.eup %3055  ;;  %3067 = vpow2.f32 %v1639_v16  ;;  %1683 = vmatpush.xpose.msrb.mxu1 %v3050_v54  ;;  %1720 = vmatpush.xpose.msrb.mxu3 %v3054_v62  ;;  %v1637_v44 = vmul.f32 1.442695, %v5082_v2  ;;  %v1473_v14 = vsub.f32 %v1249_v47, %v5084_v34  ;;  %v5087_v16 = vsub.f32 %v5085_v43, %v5086_v56  ;;  %v5090_v25 = vld [vmem:[#allocation33_spill] sm:$0xff]  ;;  %v5096_v47 = vld [vmem:[#allocation46_spill] sm:$0xff]  ;;  %v5099_v2 = vld [vmem:[#allocation84_spill] sm:$0xff] }
 0x3ad   :  { %v3058_v51 = vpop.eup %3057  ;;  %3069 = vpow2.f32 %v1641_v50  ;;  %2095 = vperm.xlu0 %3034, %v1835_v40   ;;  %1952 = vperm.xlu1 %3031, %v5070_v53   ;;  %v1474_v54 = vsub.f32 %v1250_v7, %v5084_v34  ;;  %v1557_v50 = vmul.f32 1.442695, %v5089_v19  ;;  %v1247_v49 = vmul.f32 %v3917_v27, %v5090_v25 }
 0x3ae   :  { %v3060_v30 = vpop.eup %3059  ;;  %3071 = vpow2.f32 %v1559_v0  ;;  %v1555_v60 = vmul.f32 1.442695, %v5087_v16  ;;  %2170 = vperm.xlu2 %3033, %v1850_v6   ;;  %v5093_v0 = vsub.f32 %v5091_v58, %v5092_v24  ;;  %v1248_v37 = vmul.f32 %v3920_v21, %v5090_v25  ;;  %v5105_v58 = vld [vmem:[#allocation66_spill] sm:$0xff] }
 0x3af   :  { %v3062_v28 = vpop.eup %3061  ;;  %3073 = vpow2.f32 %v1561_v48  ;;  %1664 = vmatpush.xpose.msrb.mxu0 %v3056_v26  ;;  %v4518_v53 = vpop.permute.xlu2 %1896  ;;  %1701 = vmatpush.xpose.msrb.mxu2 %v3060_v30  ;;  %v5095_v48 = vsub.f32 %v5094_v38, %v5092_v24  ;;  %v1551_v41 = vmul.f32 1.442695, %v1473_v14  ;;  %v1471_v12 = vsub.f32 %v1247_v49, %v5096_v47  ;;  %v5101_v14 = vld [vmem:[#allocation83_spill] sm:$0xff]  ;;  %v5106_v24 = vld [vmem:[#allocation68_spill] sm:$0xff] }
 0x3b0   :  { %v3064_v33 = vpop.eup %3063  ;;  %v1631_v15 = vmul.f32 1.442695, %v5093_v0  ;;  %3075 = vpow2.f32 %v1635_v5  ;;  %1684 = vmatpush.xpose.msrb.mxu1 %v3058_v51  ;;  %1721 = vmatpush.xpose.msrb.mxu3 %v3062_v28  ;;  %v1553_v22 = vmul.f32 1.442695, %v1474_v54  ;;  %v1472_v5 = vsub.f32 %v1248_v37, %v5096_v47  ;;  %v5097_v51 = vld [vmem:[#allocation31_spill] sm:$0xff] }
 0x3b1   :  { %v3066_v62 = vpop.eup %3065  ;;  %v1633_v18 = vmul.f32 1.442695, %v5095_v48  ;;  %3077 = vpow2.f32 %v1637_v44  ;;  %v1245_v7 = vmul.f32 %v3917_v27, %v5097_v51  ;;  %v5100_v44 = vsub.f32 %v5098_v45, %v5099_v2  ;;  %v5108_v37 = vld [vmem:[#allocation67_spill] sm:$0xff]  ;;  %v5113_v45 = vld [vmem:[#allocation81_spill] sm:$0xff] }
 0x3b2   :  { %v3068_v26 = vpop.eup %3067  ;;  %3079 = vpow2.f32 %v1555_v60  ;;  %v1246_v34 = vmul.f32 %v3920_v21, %v5097_v51  ;;  %v5102_v43 = vsub.f32 %v5101_v14, %v5099_v2  ;;  %v5103_v60 = vld [vmem:[#allocation39_spill] sm:$0xff]  ;;  %v1547_v54 = vmul.f32 1.442695, %v1471_v12 }
 0x3b3   :  { %v3070_v46 = vpop.eup %3069  ;;  %3081 = vpow2.f32 %v1557_v50  ;;  %1665 = vmatpush.xpose.msrb.mxu0 %v3064_v33  ;;  %1702 = vmatpush.xpose.msrb.mxu2 %v3068_v26  ;;  %v1627_v6 = vmul.f32 1.442695, %v5100_v44  ;;  %v1469_v28 = vsub.f32 %v1245_v7, %v5103_v60  ;;  %v1549_v50 = vmul.f32 1.442695, %v1472_v5  ;;  %v4547_v33 = vpop.permute.xlu1 %1892  ;;  %v5112_v7 = vld [vmem:[#allocation76_spill] sm:$0xff] }
 0x3b4   :  { %v3072_v40 = vpop.eup %3071  ;;  %3083 = vpow2.f32 %v1631_v15  ;;  %1685 = vmatpush.xpose.msrb.mxu1 %v3066_v62  ;;  %1722 = vmatpush.xpose.msrb.mxu3 %v3070_v46  ;;  %v1629_v56 = vmul.f32 1.442695, %v5102_v43  ;;  %v1470_v19 = vsub.f32 %v1246_v34, %v5103_v60  ;;  %v5107_v0 = vsub.f32 %v5105_v58, %v5106_v24  ;;  %v5115_v34 = vld [vmem:[#allocation77_spill] sm:$0xff] }
 0x3b5   :  { %v3074_v30 = vpop.eup %3073  ;;  %3085 = vpow2.f32 %v1633_v18  ;;  %2090 = vperm.xlu0 %3034, %v4270_v4   ;;  %1948 = vperm.xlu1 %3031, %v3595_v11   ;;  %v5104_v11 = vld [vmem:[#allocation27_spill] sm:$0xff]  ;;  %v5109_v38 = vsub.f32 %v5108_v37, %v5106_v24  ;;  %v1543_v26 = vmul.f32 1.442695, %v1469_v28  ;;  %v5114_v2 = vsub.f32 %v5112_v7, %v5113_v45  ;;  %v5126_v7 = vld [vmem:[#allocation24_spill] sm:$0xff] }
 0x3b6   :  { %v3076_v16 = vpop.eup %3075  ;;  %3087 = vpow2.f32 %v1551_v41  ;;  %2165 = vperm.xlu2 %3033, %v4274_v36   ;;  %v1243_v49 = vmul.f32 %v3917_v27, %v5104_v11  ;;  %v1623_v15 = vmul.f32 1.442695, %v5107_v0  ;;  %v1244_v62 = vmul.f32 %v3920_v21, %v5104_v11  ;;  %v5110_v41 = vld [vmem:[#allocation42_spill] sm:$0xff] }
 0x3b7   :  { %v3078_v42 = vpop.eup %3077  ;;  %3089 = vpow2.f32 %v1553_v22  ;;  %1666 = vmatpush.xpose.msrb.mxu0 %v3072_v40  ;;  %v4549_v25 = vpop.permute.xlu2 %1908  ;;  %1703 = vmatpush.xpose.msrb.mxu2 %v3076_v16  ;;  %v1625_v48 = vmul.f32 1.442695, %v5109_v38  ;;  %v1545_v46 = vmul.f32 1.442695, %v1470_v19  ;;  %v5111_v40 = vld [vmem:[#allocation26_spill] sm:$0xff]  ;;  %v5116_v14 = vsub.f32 %v5115_v34, %v5113_v45  ;;  %v5117_v16 = vld [vmem:[#allocation37_spill] sm:$0xff] }
 0x3b8   :  { %v3080_v4 = vpop.eup %3079  ;;  %3091 = vpow2.f32 %v1627_v6  ;;  %1686 = vmatpush.xpose.msrb.mxu1 %v3074_v30  ;;  %1723 = vmatpush.xpose.msrb.mxu3 %v3078_v42  ;;  %v1467_v47 = vsub.f32 %v1243_v49, %v5110_v41  ;;  %v1468_v22 = vsub.f32 %v1244_v62, %v5110_v41  ;;  %v1241_v51 = vmul.f32 %v3917_v27, %v5111_v40  ;;  %v5119_v11 = vld [vmem:[#allocation62_spill] sm:$0xff]  ;;  %v5120_v49 = vld [vmem:[#allocation64_spill] sm:$0xff] }
 0x3b9   :  { %v3082_v36 = vpop.eup %3081  ;;  %3093 = vpow2.f32 %v1629_v56  ;;  %v1619_v44 = vmul.f32 1.442695, %v5114_v2  ;;  %v1242_v30 = vmul.f32 %v3920_v21, %v5111_v40  ;;  %v1621_v43 = vmul.f32 1.442695, %v5116_v14  ;;  %v5125_v41 = vld [vmem:[#allocation40_spill] sm:$0xff] }
 0x3ba   :  { %v3084_v18 = vpop.eup %3083  ;;  %3095 = vpow2.f32 %v1547_v54  ;;  %v1465_v60 = vsub.f32 %v1241_v51, %v5117_v16  ;;  %v1539_v28 = vmul.f32 1.442695, %v1467_v47  ;;  %v1541_v19 = vmul.f32 1.442695, %v1468_v22  ;;  %v5127_v2 = vld [vmem:[#allocation60_spill] sm:$0xff] }
 0x3bb   :  { %v3086_v12 = vpop.eup %3085  ;;  %3097 = vpow2.f32 %v1549_v50  ;;  %1667 = vmatpush.xpose.msrb.mxu0 %v3080_v4  ;;  %1704 = vmatpush.xpose.msrb.mxu2 %v3084_v18  ;;  %v1466_v42 = vsub.f32 %v1242_v30, %v5117_v16  ;;  %v5121_v58 = vsub.f32 %v5119_v11, %v5120_v49  ;;  %v4590_v37 = vpop.permute.xlu1 %1900  ;;  %v1237_v45 = vmul.f32 %v3917_v27, %v5126_v7  ;;  %v5129_v30 = vld [vmem:[#allocation75_spill] sm:$0xff] }
 0x3bc   :  { %v3088_v5 = vpop.eup %3087  ;;  %3099 = vpow2.f32 %v1623_v15  ;;  %1687 = vmatpush.xpose.msrb.mxu1 %v3082_v36  ;;  %1724 = vmatpush.xpose.msrb.mxu3 %v3086_v12  ;;  %v5122_v15 = vld [vmem:[#allocation63_spill] sm:$0xff]  ;;  %v4595_v12 = vpop.permute.xlu0 %1904 }
 0x3bd   :  { %v3090_v6 = vpop.eup %3089  ;;  %3101 = vpow2.f32 %v1625_v48  ;;  %2085 = vperm.xlu0 %3034, %v4288_v23   ;;  %1944 = vperm.xlu1 %3031, %v3591_v10   ;;  %v5118_v23 = vld [vmem:[#allocation30_spill] sm:$0xff]  ;;  %v1615_v24 = vmul.f32 1.442695, %v5121_v58  ;;  %v5123_v36 = vsub.f32 %v5122_v15, %v5120_v49 }
 0x3be   :  { %v3092_v56 = vpop.eup %3091  ;;  %3103 = vpow2.f32 %v1543_v26  ;;  %2160 = vperm.xlu2 %3033, %v4297_v13   ;;  %v1239_v10 = vmul.f32 %v3917_v27, %v5118_v23  ;;  %v1240_v0 = vmul.f32 %v3920_v21, %v5118_v23  ;;  %v5124_v48 = vld [vmem:[#allocation34_spill] sm:$0xff]  ;;  %v1535_v26 = vmul.f32 1.442695, %v1465_v60  ;;  %v5131_v60 = vld [vmem:[#allocation71_spill] sm:$0xff]  ;;  %v5134_v23 = vld [vmem:[#allocation36_spill] sm:$0xff] }
 0x3bf   :  { %v3094_v54 = vpop.eup %3093  ;;  %3105 = vpow2.f32 %v1545_v46  ;;  %1668 = vmatpush.xpose.msrb.mxu0 %v3088_v5  ;;  %v4578_v50 = vpop.permute.xlu2 %1916  ;;  %1705 = vmatpush.xpose.msrb.mxu2 %v3092_v56  ;;  %v1617_v62 = vmul.f32 1.442695, %v5123_v36  ;;  %v1277_v18 = vmul.f32 %v3917_v27, %v5124_v48  ;;  %v1278_v22 = vmul.f32 %v3920_v21, %v5124_v48 }
 0x3c0   :  { %v3096_v4 = vpop.eup %3095  ;;  %3107 = vpow2.f32 %v1619_v44  ;;  %1688 = vmatpush.xpose.msrb.mxu1 %v3090_v6  ;;  %1725 = vmatpush.xpose.msrb.mxu3 %v3094_v54  ;;  %v1463_v47 = vsub.f32 %v1239_v10, %v5125_v41  ;;  %v1537_v5 = vmul.f32 1.442695, %v1466_v42  ;;  %v1464_v40 = vsub.f32 %v1240_v0, %v5125_v41  ;;  %v5128_v6 = vld [vmem:[#allocation70_spill] sm:$0xff] }
 0x3c1   :  { %v3098_v13 = vpop.eup %3097  ;;  %3109 = vpow2.f32 %v1621_v43  ;;  %v1501_v44 = vsub.f32 %v1277_v18, %v5127_v2  ;;  %v5130_v34 = vsub.f32 %v5128_v6, %v5129_v30  ;;  %v1238_v56 = vmul.f32 %v3920_v21, %v5126_v7  ;;  %v5135_v0 = vld [vmem:[#allocation22_spill] sm:$0xff] }
 0x3c2   :  { %v3100_v38 = vpop.eup %3099  ;;  %3111 = vpow2.f32 %v1539_v28  ;;  %v1502_v16 = vsub.f32 %v1278_v22, %v5127_v2  ;;  %v5132_v28 = vsub.f32 %v5131_v60, %v5129_v30  ;;  %v1461_v10 = vsub.f32 %v1237_v45, %v5134_v23 }
 0x3c3   :  { %v3102_v46 = vpop.eup %3101  ;;  %3113 = vpow2.f32 %v1541_v19  ;;  %1669 = vmatpush.xpose.msrb.mxu0 %v3096_v4  ;;  %1706 = vmatpush.xpose.msrb.mxu2 %v3100_v38  ;;  %v1611_v14 = vmul.f32 1.442695, %v5130_v34  ;;  %v5133_v19 = vld [vmem:[#allocation29_spill] sm:$0xff]  ;;  %v1531_v11 = vmul.f32 1.442695, %v1463_v47  ;;  %v1235_v15 = vmul.f32 %v3917_v27, %v5135_v0  ;;  %v5137_v47 = vld [vmem:[#allocation32_spill] sm:$0xff] }
 0x3c4   :  { %v3104_v51 = vpop.eup %3103  ;;  %3115 = vpow2.f32 %v1615_v24  ;;  %1689 = vmatpush.xpose.msrb.mxu1 %v3098_v13  ;;  %1726 = vmatpush.xpose.msrb.mxu3 %v3102_v46  ;;  %v1613_v54 = vmul.f32 1.442695, %v5132_v28  ;;  %v1275_v4 = vmul.f32 %v3917_v27, %v5133_v19  ;;  %v1276_v58 = vmul.f32 %v3920_v21, %v5133_v19  ;;  %v4637_v30 = vpop.permute.xlu0 %1924  ;;  %v5139_v34 = vld [vmem:[#allocation59_spill] sm:$0xff] }
 0x3c5   :  { %v3106_v43 = vpop.eup %3105  ;;  %3117 = vpow2.f32 %v1617_v62  ;;  %2150 = vperm.xlu0 %3034, %v4301_v59   ;;  %1940 = vperm.xlu1 %3031, %v3588_v9   ;;  %v1462_v24 = vsub.f32 %v1238_v56, %v5134_v23  ;;  %v1533_v59 = vmul.f32 1.442695, %v1464_v40  ;;  %v1607_v36 = vmul.f32 1.442695, %v1501_v44  ;;  %v5136_v62 = vld [vmem:[#allocation69_spill] sm:$0xff]  ;;  %v4635_v44 = vpop.permute.xlu1 %1912 }
 0x3c6   :  { %v3108_v42 = vpop.eup %3107  ;;  %3119 = vpow2.f32 %v1535_v26  ;;  %2155 = vperm.xlu2 %3033, %v4309_v29   ;;  %v1499_v38 = vsub.f32 %v1275_v4, %v5136_v62  ;;  %v1236_v48 = vmul.f32 %v3920_v21, %v5135_v0  ;;  %v1609_v18 = vmul.f32 1.442695, %v1502_v16  ;;  %v5142_v0 = vld [vmem:[#allocation28_spill] sm:$0xff] }
 0x3c7   :  { %v3110_v49 = vpop.eup %3109  ;;  %3121 = vpow2.f32 %v1537_v5  ;;  %1670 = vmatpush.xpose.msrb.mxu0 %v3104_v51  ;;  %v4621_v9 = vpop.permute.xlu2 %1928  ;;  %1707 = vmatpush.xpose.msrb.mxu2 %v3108_v42  ;;  %v1500_v26 = vsub.f32 %v1276_v58, %v5136_v62  ;;  %v1273_v46 = vmul.f32 %v3917_v27, %v5137_v47  ;;  %v1527_v22 = vmul.f32 1.442695, %v1461_v10  ;;  %v5138_v5 = vld [vmem:[#allocation38_spill] sm:$0xff] }
 0x3c8   :  { %v3112_v13 = vpop.eup %3111  ;;  %3123 = vpow2.f32 %v1611_v14  ;;  %1690 = vmatpush.xpose.msrb.mxu1 %v3106_v43  ;;  %1727 = vmatpush.xpose.msrb.mxu3 %v3110_v49  ;;  %v1459_v40 = vsub.f32 %v1235_v15, %v5138_v5  ;;  %v1274_v7 = vmul.f32 %v3920_v21, %v5137_v47  ;;  %v1529_v45 = vmul.f32 1.442695, %v1462_v24  ;;  %v5141_v49 = vld [vmem:[#allocation65_spill] sm:$0xff] }
 0x3c9   :  { %v3114_v29 = vpop.eup %3113  ;;  %3125 = vpow2.f32 %v1613_v54  ;;  %v1460_v2 = vsub.f32 %v1236_v48, %v5138_v5  ;;  %v1497_v14 = vsub.f32 %v1273_v46, %v5139_v34  ;;  %v1603_v43 = vmul.f32 1.442695, %v1499_v38  ;;  %v5140_v54 = vld [vmem:[#allocation25_spill] sm:$0xff]  ;;  %v5144_v5 = vld [vmem:[#allocation23_spill] sm:$0xff] }
 0x3ca   :  { %v3116_v41 = vpop.eup %3115  ;;  %3127 = vpow2.f32 %v1531_v11  ;;  %v1498_v16 = vsub.f32 %v1274_v7, %v5139_v34  ;;  %v1605_v60 = vmul.f32 1.442695, %v1500_v26  ;;  %v1271_v42 = vmul.f32 %v3917_v27, %v5140_v54  ;;  %v5145_v34 = vld [vmem:[#allocation61_spill] sm:$0xff] }
 0x3cb   :  { %v3118_v51 = vpop.eup %3117  ;;  %3129 = vpow2.f32 %v1533_v59  ;;  %1671 = vmatpush.xpose.msrb.mxu0 %v3112_v13  ;;  %1708 = vmatpush.xpose.msrb.mxu2 %v3116_v41  ;;  %v1523_v19 = vmul.f32 1.442695, %v1459_v40  ;;  %v1272_v23 = vmul.f32 %v3920_v21, %v5140_v54  ;;  %v1525_v10 = vmul.f32 1.442695, %v1460_v2 }
 0x3cc   :  { %v3120_v6 = vpop.eup %3119  ;;  %3131 = vpow2.f32 %v1607_v36  ;;  %1691 = vmatpush.xpose.msrb.mxu1 %v3114_v29  ;;  %1728 = vmatpush.xpose.msrb.mxu3 %v3118_v51  ;;  %v1495_v58 = vsub.f32 %v1271_v42, %v5141_v49  ;;  %v1601_v59 = vmul.f32 1.442695, %v1498_v16  ;;  %v1269_v15 = vmul.f32 %v3917_v27, %v5142_v0  ;;  %v5143_v29 = vld [vmem:[#allocation57_spill] sm:$0xff]  ;;  %v4662_v51 = vpop.permute.xlu0 %1936 }
 0x3cd   :  { %v3122_v56 = vpop.eup %3121  ;;  %3133 = vpow2.f32 %v1609_v18  ;;  %2070 = vperm.xlu0 %3034, %v4318_v35   ;;  %2080 = vperm.xlu1 %3031, %v4333_v1   ;;  %v1599_v1 = vmul.f32 1.442695, %v1497_v14  ;;  %v1270_v62 = vmul.f32 %v3920_v21, %v5142_v0  ;;  %v1921_v46 = vpop.permute.xlu1 %1920  ;;  %v1267_v40 = vmul.f32 %v3917_v27, %v5144_v5 }
 0x3ce   :  { %v3124_v28 = vpop.eup %3123  ;;  %3135 = vpow2.f32 %v1527_v22  ;;  %2075 = vperm.xlu2 %3033, %v4351_v20   ;;  %v1496_v20 = vsub.f32 %v1272_v23, %v5141_v49  ;;  %v1493_v48 = vsub.f32 %v1269_v15, %v5143_v29  ;;  %v1595_v18 = vmul.f32 1.442695, %v1495_v58 }
 0x3cf   :  { %v3126_v4 = vpop.eup %3125  ;;  %3137 = vpow2.f32 %v1529_v45  ;;  %1672 = vmatpush.xpose.msrb.mxu0 %v3120_v6  ;;  %v4648_v11 = vpop.permute.xlu2 %1984  ;;  %1709 = vmatpush.xpose.msrb.mxu2 %v3124_v28  ;;  %v1494_v41 = vsub.f32 %v1270_v62, %v5143_v29  ;;  %v1268_v45 = vmul.f32 %v3920_v21, %v5144_v5 }
 0x3d0   :  { %v3128_v35 = vpop.eup %3127  ;;  %3139 = vpow2.f32 %v1603_v43  ;;  %1692 = vmatpush.xpose.msrb.mxu1 %v3122_v56  ;;  %1729 = vmatpush.xpose.msrb.mxu3 %v3126_v4  ;;  %v1597_v47 = vmul.f32 1.442695, %v1496_v20 }
 0x3d1   :  { %v3130_v24 = vpop.eup %3129  ;;  %3141 = vpow2.f32 %v1605_v60  ;;  %v1593_v14 = vmul.f32 1.442695, %v1494_v41  ;;  %v1492_v43 = vsub.f32 %v1268_v45, %v5145_v34 }
 0x3d2   :  { %v3132_v13 = vpop.eup %3131  ;;  %3143 = vpow2.f32 %v1523_v19 }
 0x3d3   :  { %v3134_v36 = vpop.eup %3133  ;;  %3145 = vpow2.f32 %v1525_v10  ;;  %1673 = vmatpush.xpose.msrb.mxu0 %v3128_v35  ;;  %1710 = vmatpush.xpose.msrb.mxu2 %v3132_v13  ;;  %v1589_v16 = vmul.f32 1.442695, %v1492_v43  ;;  %v5146_v10 = vld [vmem:[#allocation16_spill] sm:$0xff] }
 0x3d4   :  { %v3136_v38 = vpop.eup %3135  ;;  %3147 = vpow2.f32 %v1599_v1  ;;  %1693 = vmatpush.xpose.msrb.mxu1 %v3130_v24  ;;  %1730 = vmatpush.xpose.msrb.mxu3 %v3134_v36  ;;  %v1981_v19 = vpop.permute.xlu0 %1980  ;;  %v4676_v35 = vperm.slane %v5146_v10, 3  ;;  %v5147_v1 = vld [vmem:[#allocation17_spill] sm:$0xff] }
 0x3d5   :  { %v3138_v26 = vpop.eup %3137  ;;  %3149 = vpow2.f32 %v1601_v59  ;;  %2135 = vperm.xlu0 %3034, %v4362_v8   ;;  %2145 = vperm.xlu1 %3031, %v4366_v57   ;;  %v1591_v8 = vmul.f32 1.442695, %v1493_v48  ;;  %v1491_v57 = vsub.f32 %v1267_v40, %v5145_v34  ;;  %v4673_v54 = vpop.permute.xlu1 %1932 }
 0x3d6   :  { %v3140_v22 = vpop.eup %3139  ;;  %2140 = vperm.xlu2 %3033, %v4372_v31   ;;  %3151 = vpow2.f32 %v1595_v18  ;;  %v2049_v49 = vmul.f32 %v4676_v35, %v1981_v19  ;;  %v2051_v58 = vmul.f32 %v4676_v35, %v4648_v11  ;;  %v2019_v13 = vmul.f32 %v4676_v35, %v1921_v46 }
 0x3d7   :  { %v3142_v7 = vpop.eup %3141  ;;  %1674 = vmatpush.xpose.msrb.mxu0 %v3136_v38  ;;  %v4667_v2 = vpop.permute.xlu2 %2205  ;;  %1711 = vmatpush.xpose.msrb.mxu2 %v3140_v22  ;;  %3153 = vpow2.f32 %v1597_v47  ;;  %v1587_v21 = vmul.f32 1.442695, %v1491_v57  ;;  %v2017_v40 = vmul.f32 %v4676_v35, %v4578_v50  ;;  %v2015_v10 = vmul.f32 %v4676_v35, %v4635_v44 }
 0x3d8   :  { %v3144_v6 = vpop.eup %3143  ;;  %1694 = vmatpush.xpose.msrb.mxu1 %v3138_v26  ;;  %1731 = vmatpush.xpose.msrb.mxu3 %v3142_v7  ;;  %3155 = vpow2.f32 %v1591_v8 }
 0x3d9   :  { %v3146_v27 = vpop.eup %3145  ;;  %3157 = vpow2.f32 %v1593_v14 }
 0x3da   :  { %v3148_v31 = vpop.eup %3147  ;;  %3159 = vpow2.f32 %v1587_v21 }
 0x3db   :  { %v3150_v56 = vpop.eup %3149  ;;  %1675 = vmatpush.xpose.msrb.mxu0 %v3144_v6  ;;  %1712 = vmatpush.xpose.msrb.mxu2 %v3148_v31  ;;  %3161 = vpow2.f32 %v1589_v16 }
 0x3dc   :  { %1695 = vmatpush.xpose.msrb.mxu1 %v3146_v27  ;;  %1732 = vmatpush.xpose.msrb.mxu3 %v3150_v56  ;;  %v3152_v60 = vpop.eup %3151 }
 0x3dd   :  { %2065 = vperm.xlu1 %3031, %v4376_v17   ;;  %v3154_v28 = vpop.eup %3153  ;;  %v4679_v17 = vperm.slane %v5147_v1, 3 }
 0x3de   :  { %2060 = vperm.xlu2 %3033, %v4388_v55   ;;  %v3156_v4 = vpop.eup %3155 }
 0x3df   :  { %v2201_v42 = vpop.permute.xlu2 %2200  ;;  %1713 = vmatpush.xpose.msrb.mxu2 %v3152_v60  ;;  %v3158_v23 = vpop.eup %3157  ;;  %v2052_v24 = vmul.f32 %v4679_v17, %v4648_v11  ;;  %v2050_v20 = vmul.f32 %v4679_v17, %v1981_v19  ;;  %v2020_v0 = vmul.f32 %v4679_v17, %v1921_v46  ;;  %v2018_v7 = vmul.f32 %v4679_v17, %v4578_v50 }
 0x3e0   :  { %1733 = vmatpush.xpose.msrb.mxu3 %v3154_v28  ;;  %v3160_v55 = vpop.eup %3159 }
 0x3e1   :  { %v3162_v59 = vpop.eup %3161  ;;  %v2274_v48 = vsub.f32 %v2050_v20, %v4667_v2 }
 0x3e3   :  { %1714 = vmatpush.xpose.msrb.mxu2 %v3156_v4  ;;  %v2399_v46 = vmul.f32 1.442695, %v2274_v48 }
 0x3e4   :  { %1734 = vmatpush.xpose.msrb.mxu3 %v3158_v23 }
 0x3e5   :  { %2055 = vperm.xlu1 %3031, %v4394_v3   ;;  %v2273_v3 = vsub.f32 %v2049_v49, %v4667_v2 }
 0x3e7   :  { %v2211_v15 = vpop.permute.xlu1 %2210  ;;  %v4690_v36 = vpop.permute.xlu2 %2195  ;;  %1715 = vmatpush.xpose.msrb.mxu2 %v3160_v55  ;;  %v2397_v5 = vmul.f32 1.442695, %v2273_v3 }
 0x3e8   :  { %v2275_v62 = vsub.f32 %v2051_v58, %v2211_v15  ;;  %v2276_v38 = vsub.f32 %v2052_v24, %v2211_v15  ;;  %1735 = vmatpush.xpose.msrb.mxu3 %v3162_v59  ;;  %v2131_v29 = vpop.permute.xlu0 %2130 }
 0x3e9   :  { %v2243_v11 = vsub.f32 %v2019_v13, %v2131_v29  ;;  %v2244_v18 = vsub.f32 %v2020_v0, %v2131_v29 }
 0x3ea   :  { %v2401_v26 = vmul.f32 1.442695, %v2275_v62  ;;  %v2403_v41 = vmul.f32 1.442695, %v2276_v38 }
 0x3eb   :  { %v2337_v47 = vmul.f32 1.442695, %v2243_v11  ;;  %v2339_v22 = vmul.f32 1.442695, %v2244_v18  ;;  %v2013_v18 = vmul.f32 %v4676_v35, %v4549_v25 }
 0x3ec   :  { %3163 = vpow2.f32 %v2401_v26  ;;  %v2014_v26 = vmul.f32 %v4679_v17, %v4549_v25 }
 0x3ed   :  { %3165 = vpow2.f32 %v2403_v41 }
 0x3ee   :  { %3167 = vpow2.f32 %v2337_v47 }
 0x3ef   :  { %3169 = vpow2.f32 %v2339_v22  ;;  %v1977_v45 = vpop.permute.xlu1 %1976  ;;  %v4698_v2 = vpop.permute.xlu2 %2190 }
 0x3f0   :  { %3171 = vpow2.f32 %v2397_v5  ;;  %v2047_v6 = vmul.f32 %v4676_v35, %v1977_v45  ;;  %v2048_v8 = vmul.f32 %v4679_v17, %v1977_v45  ;;  %v2126_v34 = vpop.permute.xlu0 %2125 }
 0x3f1   :  { %3173 = vpow2.f32 %v2399_v46  ;;  %v2241_v57 = vsub.f32 %v2017_v40, %v2126_v34  ;;  %v2242_v27 = vsub.f32 %v2018_v7, %v2126_v34 }
 0x3f2   :  { %v3164_v14 = vpop.eup %3163  ;;  %v2271_v43 = vsub.f32 %v2047_v6, %v2201_v42  ;;  %v2272_v31 = vsub.f32 %v2048_v8, %v2201_v42  ;;  %v2016_v42 = vmul.f32 %v4679_v17, %v4635_v44 }
 0x3f3   :  { %v3166_v56 = vpop.eup %3165  ;;  %v2333_v21 = vmul.f32 1.442695, %v2241_v57  ;;  %2451 = vmatpush.xpose.msra.mxu2 %v3164_v14  ;;  %v2335_v28 = vmul.f32 1.442695, %v2242_v27 }
 0x3f4   :  { %v3168_v50 = vpop.eup %3167  ;;  %v2393_v16 = vmul.f32 1.442695, %v2271_v43  ;;  %v2395_v60 = vmul.f32 1.442695, %v2272_v31  ;;  %2471 = vmatpush.xpose.msra.mxu3 %v3166_v56  ;;  %v2011_v31 = vmul.f32 %v4676_v35, %v4595_v12  ;;  %v2012_v56 = vmul.f32 %v4679_v17, %v4595_v12 }
 0x3f5   :  { %v3170_v19 = vpop.eup %3169  ;;  %3175 = vpow2.f32 %v2333_v21  ;;  %2411 = vmatpush.xpose.msra.mxu0 %v3168_v50 }
 0x3f6   :  { %v3172_v4 = vpop.eup %3171  ;;  %3177 = vpow2.f32 %v2393_v16  ;;  %2431 = vmatpush.xpose.msra.mxu1 %v3170_v19 }
 0x3f7   :  { %v3174_v23 = vpop.eup %3173  ;;  %3179 = vpow2.f32 %v2395_v60  ;;  %v1973_v1 = vpop.permute.xlu1 %1972  ;;  %2452 = vmatpush.xpose.msra.mxu2 %v3172_v4 }
 0x3f8   :  { %v4706_v55 = vpop.permute.xlu2 %2185  ;;  %3181 = vpow2.f32 %v2335_v28  ;;  %v2045_v49 = vmul.f32 %v4676_v35, %v1973_v1  ;;  %v2046_v58 = vmul.f32 %v4679_v17, %v1973_v1  ;;  %2472 = vmatpush.xpose.msra.mxu3 %v3174_v23  ;;  %v2121_v24 = vpop.permute.xlu0 %2120 }
 0x3f9   :  { %v2239_v59 = vsub.f32 %v2015_v10, %v2121_v24  ;;  %v2240_v20 = vsub.f32 %v2016_v42, %v2121_v24 }
 0x3fa   :  { %v2269_v13 = vsub.f32 %v2045_v49, %v4690_v36  ;;  %v2270_v0 = vsub.f32 %v2046_v58, %v4690_v36 }
 0x3fb   :  { %v3176_v15 = vpop.eup %3175  ;;  %v2329_v44 = vmul.f32 1.442695, %v2239_v59  ;;  %v2331_v29 = vmul.f32 1.442695, %v2240_v20  ;;  %v2009_v20 = vmul.f32 %v4676_v35, %v4590_v37 }
 0x3fc   :  { %v3178_v3 = vpop.eup %3177  ;;  %v2389_v62 = vmul.f32 1.442695, %v2269_v13  ;;  %v2391_v38 = vmul.f32 1.442695, %v2270_v0  ;;  %2412 = vmatpush.xpose.msra.mxu0 %v3176_v15  ;;  %v2010_v13 = vmul.f32 %v4679_v17, %v4590_v37 }
 0x3fd   :  { %v3180_v48 = vpop.eup %3179  ;;  %3183 = vpow2.f32 %v2329_v44  ;;  %2453 = vmatpush.xpose.msra.mxu2 %v3178_v3 }
 0x3fe   :  { %v3182_v11 = vpop.eup %3181  ;;  %3185 = vpow2.f32 %v2389_v62  ;;  %2473 = vmatpush.xpose.msra.mxu3 %v3180_v48 }
 0x3ff   :  { %3187 = vpow2.f32 %v2391_v38  ;;  %2432 = vmatpush.xpose.msra.mxu1 %v3182_v11  ;;  %v1969_v36 = vpop.permute.xlu1 %1968 }
 0x400   :  { %v4716_v41 = vpop.permute.xlu2 %2180  ;;  %3189 = vpow2.f32 %v2331_v29  ;;  %v2043_v47 = vmul.f32 %v4676_v35, %v1969_v36  ;;  %v2044_v22 = vmul.f32 %v4679_v17, %v1969_v36  ;;  %v2116_v5 = vpop.permute.xlu0 %2115 }
 0x401   :  { %v2237_v46 = vsub.f32 %v2013_v18, %v2116_v5  ;;  %v2238_v40 = vsub.f32 %v2014_v26, %v2116_v5 }
 0x402   :  { %v2267_v7 = vsub.f32 %v2043_v47, %v4698_v2  ;;  %v2268_v45 = vsub.f32 %v2044_v22, %v4698_v2 }
 0x403   :  { %v3184_v6 = vpop.eup %3183  ;;  %v2325_v8 = vmul.f32 1.442695, %v2237_v46  ;;  %v2327_v27 = vmul.f32 1.442695, %v2238_v40  ;;  %v2007_v46 = vmul.f32 %v4676_v35, %v4518_v53  ;;  %v2008_v40 = vmul.f32 %v4679_v17, %v4518_v53 }
 0x404   :  { %v3186_v25 = vpop.eup %3185  ;;  %v2385_v34 = vmul.f32 1.442695, %v2267_v7  ;;  %v2387_v57 = vmul.f32 1.442695, %v2268_v45  ;;  %2413 = vmatpush.xpose.msra.mxu0 %v3184_v6 }
 0x405   :  { %v3188_v14 = vpop.eup %3187  ;;  %3191 = vpow2.f32 %v2325_v8  ;;  %2454 = vmatpush.xpose.msra.mxu2 %v3186_v25 }
 0x406   :  { %v3190_v43 = vpop.eup %3189  ;;  %3193 = vpow2.f32 %v2385_v34  ;;  %2474 = vmatpush.xpose.msra.mxu3 %v3188_v14 }
 0x407   :  { %3195 = vpow2.f32 %v2387_v57  ;;  %2433 = vmatpush.xpose.msra.mxu1 %v3190_v43  ;;  %v1965_v2 = vpop.permute.xlu1 %1964 }
 0x408   :  { %v4726_v21 = vpop.permute.xlu2 %2175  ;;  %3197 = vpow2.f32 %v2327_v27  ;;  %v2041_v50 = vmul.f32 %v4676_v35, %v1965_v2  ;;  %v2042_v16 = vmul.f32 %v4679_v17, %v1965_v2  ;;  %v2111_v60 = vpop.permute.xlu0 %2110 }
 0x409   :  { %v2235_v28 = vsub.f32 %v2011_v31, %v2111_v60  ;;  %v2236_v19 = vsub.f32 %v2012_v56, %v2111_v60  ;;  %v2005_v60 = vmul.f32 %v4676_v35, %v4547_v33 }
 0x40a   :  { %v2265_v4 = vsub.f32 %v2041_v50, %v4706_v55  ;;  %v2266_v23 = vsub.f32 %v2042_v16, %v4706_v55 }
 0x40b   :  { %v3192_v10 = vpop.eup %3191  ;;  %v2321_v42 = vmul.f32 1.442695, %v2235_v28  ;;  %v2323_v58 = vmul.f32 1.442695, %v2236_v19 }
 0x40c   :  { %v3194_v12 = vpop.eup %3193  ;;  %v2381_v1 = vmul.f32 1.442695, %v2265_v4  ;;  %v2383_v49 = vmul.f32 1.442695, %v2266_v23  ;;  %2414 = vmatpush.xpose.msra.mxu0 %v3192_v10 }
 0x40d   :  { %v3196_v24 = vpop.eup %3195  ;;  %3199 = vpow2.f32 %v2321_v42  ;;  %2455 = vmatpush.xpose.msra.mxu2 %v3194_v12 }
 0x40e   :  { %v3198_v59 = vpop.eup %3197  ;;  %3201 = vpow2.f32 %v2381_v1  ;;  %2475 = vmatpush.xpose.msra.mxu3 %v3196_v24 }
 0x40f   :  { %3203 = vpow2.f32 %v2383_v49  ;;  %2434 = vmatpush.xpose.msra.mxu1 %v3198_v59  ;;  %v1961_v55 = vpop.permute.xlu1 %1960 }
 0x410   :  { %3205 = vpow2.f32 %v2323_v58  ;;  %v2039_v0 = vmul.f32 %v4676_v35, %v1961_v55  ;;  %v2040_v15 = vmul.f32 %v4679_v17, %v1961_v55  ;;  %v2106_v44 = vpop.permute.xlu0 %2105  ;;  %v2171_v3 = vpop.permute.xlu2 %2170 }
 0x411   :  { %v2233_v62 = vsub.f32 %v2009_v20, %v2106_v44  ;;  %v2234_v38 = vsub.f32 %v2010_v13, %v2106_v44  ;;  %v2004_v44 = vmul.f32 %v4679_v17, %v4471_v39 }
 0x412   :  { %v2263_v29 = vsub.f32 %v2039_v0, %v4716_v41  ;;  %v2264_v48 = vsub.f32 %v2040_v15, %v4716_v41  ;;  %v2003_v15 = vmul.f32 %v4676_v35, %v4471_v39 }
 0x413   :  { %v3200_v11 = vpop.eup %3199  ;;  %v2317_v18 = vmul.f32 1.442695, %v2233_v62  ;;  %v2319_v47 = vmul.f32 1.442695, %v2234_v38 }
 0x414   :  { %v3202_v26 = vpop.eup %3201  ;;  %v2377_v37 = vmul.f32 1.442695, %v2263_v29  ;;  %v2379_v36 = vmul.f32 1.442695, %v2264_v48  ;;  %2415 = vmatpush.xpose.msra.mxu0 %v3200_v11 }
 0x415   :  { %v3204_v22 = vpop.eup %3203  ;;  %3207 = vpow2.f32 %v2317_v18  ;;  %2456 = vmatpush.xpose.msra.mxu2 %v3202_v26  ;;  %v3299_v18 = vld [vmem:[#allocation10] sm:$0x3f] }
 0x416   :  { %v3206_v5 = vpop.eup %3205  ;;  %3209 = vpow2.f32 %v2377_v37  ;;  %2476 = vmatpush.xpose.msra.mxu3 %v3204_v22  ;;  %v224_v26 = vperm.slane %v3299_v18, 4  ;;  %v825_v37 = vpop.f32.mrf.mxu0 }
 0x417   :  { %3211 = vpow2.f32 %v2379_v36  ;;  %2435 = vmatpush.xpose.msra.mxu1 %v3206_v5  ;;  %v1957_v41 = vpop.permute.xlu1 %1956  ;;  %v225_v36 = vperm.slane %v3299_v18, 5  ;;  %v838_v5 = vpop.f32.mrf.mxu1 }
 0x418   :  { %3213 = vpow2.f32 %v2319_v47  ;;  %v2037_v7 = vmul.f32 %v4676_v35, %v1957_v41  ;;  %v2038_v45 = vmul.f32 %v4679_v17, %v1957_v41  ;;  %v2101_v6 = vpop.permute.xlu0 %2100  ;;  %v4748_v14 = vpop.permute.xlu2 %2165 }
 0x419   :  { %v2231_v8 = vsub.f32 %v2007_v46, %v2101_v6  ;;  %v2232_v25 = vsub.f32 %v2008_v40, %v2101_v6  ;;  %v851_v47 = vpop.f32.mrf.mxu2  ;;  %v864_v46 = vpop.f32.mrf.mxu3 }
 0x41a   :  { %v2261_v34 = vsub.f32 %v2037_v7, %v4726_v21  ;;  %v2262_v57 = vsub.f32 %v2038_v45, %v4726_v21  ;;  %v2006_v21 = vmul.f32 %v4679_v17, %v4547_v33  ;;  %v826_v7 = vadd.f32 %v825_v37, %v224_v26 }
 0x41b   :  { %v3208_v27 = vpop.eup %3207  ;;  %v2313_v43 = vmul.f32 1.442695, %v2231_v8  ;;  %v2315_v2 = vmul.f32 1.442695, %v2232_v25  ;;  %v852_v45 = vadd.f32 %v851_v47, %v225_v36 }
 0x41c   :  { %v3210_v53 = vpop.eup %3209  ;;  %v2373_v31 = vmul.f32 1.442695, %v2261_v34  ;;  %v2375_v56 = vmul.f32 1.442695, %v2262_v57  ;;  %2416 = vmatpush.xpose.msra.mxu0 %v3208_v27  ;;  %v4766_v27 = vadd.f32 %v838_v5, %v826_v7 }
 0x41d   :  { %v3212_v50 = vpop.eup %3211  ;;  %3215 = vpow2.f32 %v2313_v43  ;;  %2457 = vmatpush.xpose.msra.mxu2 %v3210_v53  ;;  %v4768_v43 = vadd.f32 %v864_v46, %v852_v45  ;;  %v1999_v46 = vmul.f32 %v4676_v35, %v4311_v32 }
 0x41e   :  { %v3214_v16 = vpop.eup %3213  ;;  %3217 = vpow2.f32 %v2373_v31  ;;  %2477 = vmatpush.xpose.msra.mxu3 %v3212_v50  ;;  %v2002_v31 = vmul.f32 %v4679_v17, %v4505_v63 }
 0x41f   :  { %3219 = vpow2.f32 %v2375_v56  ;;  %2436 = vmatpush.xpose.msra.mxu1 %v3214_v16  ;;  %v1953_v28 = vpop.permute.xlu1 %1952 }
 0x420   :  { %3221 = vpow2.f32 %v2315_v2  ;;  %v2035_v19 = vmul.f32 %v4676_v35, %v1953_v28  ;;  %v2036_v4 = vmul.f32 %v4679_v17, %v1953_v28  ;;  %v2096_v23 = vpop.permute.xlu0 %2095  ;;  %v4756_v55 = vpop.permute.xlu2 %2160 }
 0x421   :  { %v2229_v10 = vsub.f32 %v2005_v60, %v2096_v23  ;;  %v2230_v42 = vsub.f32 %v2006_v21, %v2096_v23  ;;  %v1653_v21 = vrot.slane %v4766_v27, 4  ;;  %v827_v23 = vpop.f32.mrf.mxu0 }
 0x422   :  { %v2259_v12 = vsub.f32 %v2035_v19, %v2171_v3  ;;  %v2260_v1 = vsub.f32 %v2036_v4, %v2171_v3  ;;  %v1654_v4 = vrot.slane %v4768_v43, 4 }
 0x423   :  { %v3216_v49 = vpop.eup %3215  ;;  %v2309_v58 = vmul.f32 1.442695, %v2229_v10  ;;  %v2311_v13 = vmul.f32 1.442695, %v2230_v42  ;;  %v853_v10 = vpop.f32.mrf.mxu2 }
 0x424   :  { %v3218_v24 = vpop.eup %3217  ;;  %v2369_v59 = vmul.f32 1.442695, %v2259_v12  ;;  %v2371_v20 = vmul.f32 1.442695, %v2260_v1  ;;  %2417 = vmatpush.xpose.msra.mxu0 %v3216_v49  ;;  %v840_v12 = vpop.f32.mrf.mxu1  ;;  %v2023_v10 = vmul.f32 %v4676_v35, %v4621_v9 }
 0x425   :  { %v3220_v33 = vpop.eup %3219  ;;  %3223 = vpow2.f32 %v2309_v58  ;;  %2458 = vmatpush.xpose.msra.mxu2 %v3218_v24  ;;  %v866_v1 = vpop.f32.mrf.mxu3 }
 0x426   :  { %v3222_v0 = vpop.eup %3221  ;;  %3225 = vpow2.f32 %v2369_v59  ;;  %2478 = vmatpush.xpose.msra.mxu3 %v3220_v33  ;;  %v2021_v1 = vmul.f32 %v4676_v35, %v4637_v30 }
 0x427   :  { %3227 = vpow2.f32 %v2371_v20  ;;  %2437 = vmatpush.xpose.msra.mxu1 %v3222_v0  ;;  %v1949_v3 = vpop.permute.xlu1 %1948 }
 0x428   :  { %3229 = vpow2.f32 %v2311_v13  ;;  %v2033_v62 = vmul.f32 %v4676_v35, %v1949_v3  ;;  %v2034_v38 = vmul.f32 %v4679_v17, %v1949_v3  ;;  %v2091_v29 = vpop.permute.xlu0 %2090  ;;  %v2156_v56 = vpop.permute.xlu2 %2155  ;;  %v1658_v13 = vsel %vm1657_vm3, %v1653_v21, 1.0 }
 0x429   :  { %v2227_v48 = vsub.f32 %v2003_v15, %v2091_v29  ;;  %v2228_v11 = vsub.f32 %v2004_v44, %v2091_v29  ;;  %1676 = vmatmul.f32.vlgmr.msrb.gmra.mxu0 %v1658_v13  ;;  %v1659_v15 = vsel %vm1657_vm3, %v1654_v4, 1.0  ;;  %1716 = vmatmul.f32.vlgmr.msrb.gmra.mxu2 %v1658_v13  ;;  %v2027_v3 = vmul.f32 %v4676_v35, %v4662_v51 }
 0x42a   :  { %v2257_v22 = vsub.f32 %v2033_v62, %v4748_v14  ;;  %v2258_v39 = vsub.f32 %v2034_v38, %v4748_v14  ;;  %v2001_v14 = vmul.f32 %v4676_v35, %v4505_v63  ;;  %1696 = vmatmul.f32.vlgmr.msrb.gmra.mxu1 %v1659_v15  ;;  %1736 = vmatmul.f32.vlgmr.msrb.gmra.mxu3 %v1659_v15 }
 0x42b   :  { %v3224_v40 = vpop.eup %3223  ;;  %v2305_v41 = vmul.f32 1.442695, %v2227_v48  ;;  %v2307_v34 = vmul.f32 1.442695, %v2228_v11  ;;  %v2028_v48 = vmul.f32 %v4679_v17, %v4662_v51  ;;  %v1997_v51 = vmul.f32 %v4676_v35, %v4456_v61 }
 0x42c   :  { %v3226_v6 = vpop.eup %3225  ;;  %v2365_v8 = vmul.f32 1.442695, %v2257_v22  ;;  %v2367_v25 = vmul.f32 1.442695, %v2258_v39  ;;  %2418 = vmatpush.xpose.msra.mxu0 %v3224_v40 }
 0x42d   :  { %v3228_v57 = vpop.eup %3227  ;;  %3231 = vpow2.f32 %v2305_v41  ;;  %2459 = vmatpush.xpose.msra.mxu2 %v3226_v6  ;;  %v2000_v41 = vmul.f32 %v4679_v17, %v4311_v32  ;;  %v1998_v6 = vmul.f32 %v4679_v17, %v4456_v61 }
 0x42e   :  { %v3230_v53 = vpop.eup %3229  ;;  %3233 = vpow2.f32 %v2365_v8  ;;  %2479 = vmatpush.xpose.msra.mxu3 %v3228_v57 }
 0x42f   :  { %3235 = vpow2.f32 %v2367_v25  ;;  %2438 = vmatpush.xpose.msra.mxu1 %v3230_v53  ;;  %v1945_v2 = vpop.permute.xlu1 %1944 }
 0x430   :  { %3237 = vpow2.f32 %v2307_v34  ;;  %v2031_v50 = vmul.f32 %v4676_v35, %v1945_v2  ;;  %v2032_v16 = vmul.f32 %v4679_v17, %v1945_v2  ;;  %v2086_v60 = vpop.permute.xlu0 %2085  ;;  %v2076_v11 = vpop.permute.xlu2 %2075  ;;  %v5148_v34 = vld [vmem:[#allocation89_spill] sm:$0xff] }
 0x431   :  { %v2225_v28 = vsub.f32 %v2001_v14, %v2086_v60  ;;  %v2226_v19 = vsub.f32 %v2002_v31, %v2086_v60  ;;  %v1995_v57 = vmul.f32 %v4676_v35, %v5148_v34  ;;  %v2221_v53 = vsub.f32 %v1997_v51, %v2076_v11 }
 0x432   :  { %v2255_v63 = vsub.f32 %v2031_v50, %v4756_v55  ;;  %v2256_v42 = vsub.f32 %v2032_v16, %v4756_v55  ;;  %v2222_v2 = vsub.f32 %v1998_v6, %v2076_v11 }
 0x433   :  { %v3232_v49 = vpop.eup %3231  ;;  %v2301_v58 = vmul.f32 1.442695, %v2225_v28  ;;  %v2303_v0 = vmul.f32 1.442695, %v2226_v19  ;;  %v2293_v19 = vmul.f32 1.442695, %v2221_v53 }
 0x434   :  { %v3234_v24 = vpop.eup %3233  ;;  %v2361_v59 = vmul.f32 1.442695, %v2255_v63  ;;  %v2363_v20 = vmul.f32 1.442695, %v2256_v42  ;;  %2419 = vmatpush.xpose.msra.mxu0 %v3232_v49  ;;  %v2295_v23 = vmul.f32 1.442695, %v2222_v2  ;;  %v2025_v63 = vmul.f32 %v4676_v35, %v4673_v54 }
 0x435   :  { %v3236_v33 = vpop.eup %3235  ;;  %2460 = vmatpush.xpose.msra.mxu2 %v3234_v24  ;;  %v2026_v42 = vmul.f32 %v4679_v17, %v4673_v54  ;;  %v2024_v49 = vmul.f32 %v4679_v17, %v4621_v9  ;;  %v2022_v54 = vmul.f32 %v4679_v17, %v4637_v30 }
 0x436   :  { %v3238_v44 = vpop.eup %3237  ;;  %3239 = vpow2.f32 %v2361_v59  ;;  %2480 = vmatpush.xpose.msra.mxu3 %v3236_v33 }
 0x437   :  { %3241 = vpow2.f32 %v2363_v20  ;;  %2439 = vmatpush.xpose.msra.mxu1 %v3238_v44  ;;  %v1941_v55 = vpop.permute.xlu1 %1940 }
 0x438   :  { %3243 = vpow2.f32 %v2301_v58  ;;  %v2029_v62 = vmul.f32 %v4676_v35, %v1941_v55  ;;  %v2030_v38 = vmul.f32 %v4679_v17, %v1941_v55  ;;  %v2151_v29 = vpop.permute.xlu0 %2150  ;;  %v2141_v60 = vpop.permute.xlu2 %2140 }
 0x439   :  { %3245 = vpow2.f32 %v2303_v0  ;;  %v2251_v37 = vsub.f32 %v2027_v3, %v2151_v29  ;;  %v2252_v36 = vsub.f32 %v2028_v48, %v2151_v29  ;;  %v2247_v20 = vsub.f32 %v2023_v10, %v2141_v60 }
 0x43a   :  { %v2253_v18 = vsub.f32 %v2029_v62, %v2156_v56  ;;  %v2254_v26 = vsub.f32 %v2030_v38, %v2156_v56  ;;  %v1996_v56 = vmul.f32 %v4679_v17, %v5148_v34  ;;  %v2248_v44 = vsub.f32 %v2024_v49, %v2141_v60 }
 0x43b   :  { %v2353_v7 = vmul.f32 1.442695, %v2251_v37  ;;  %v2355_v8 = vmul.f32 1.442695, %v2252_v36  ;;  %v2345_v48 = vmul.f32 1.442695, %v2247_v20  ;;  %v1993_v36 = vmul.f32 %v4676_v35, %v4320_v52 }
 0x43c   :  { %v3240_v47 = vpop.eup %3239  ;;  %v2357_v22 = vmul.f32 1.442695, %v2253_v18  ;;  %v2359_v39 = vmul.f32 1.442695, %v2254_v26  ;;  %v2347_v11 = vmul.f32 1.442695, %v2248_v44 }
 0x43d   :  { %v3242_v5 = vpop.eup %3241  ;;  %2461 = vmatpush.xpose.msra.mxu2 %v3240_v47  ;;  %v5149_v26 = vld [vmem:[#allocation88_spill] sm:$0xff]  ;;  %v1994_v47 = vmul.f32 %v4679_v17, %v4320_v52 }
 0x43e   :  { %v3244_v40 = vpop.eup %3243  ;;  %3247 = vpow2.f32 %v2357_v22  ;;  %2481 = vmatpush.xpose.msra.mxu3 %v3242_v5  ;;  %v1991_v37 = vmul.f32 %v4676_v35, %v5149_v26  ;;  %v1992_v5 = vmul.f32 %v4679_v17, %v5149_v26 }
 0x43f   :  { %v3246_v45 = vpop.eup %3245  ;;  %3249 = vpow2.f32 %v2359_v39  ;;  %2420 = vmatpush.xpose.msra.mxu0 %v3244_v40  ;;  %v2081_v25 = vpop.permute.xlu1 %2080 }
 0x440   :  { %2440 = vmatpush.xpose.msra.mxu1 %v3246_v45  ;;  %v2223_v32 = vsub.f32 %v1999_v46, %v2081_v25  ;;  %v2224_v14 = vsub.f32 %v2000_v41, %v2081_v25  ;;  %v2071_v31 = vpop.permute.xlu0 %2070  ;;  %3251 = vpow2.f32 %v2353_v7  ;;  %v2061_v18 = vpop.permute.xlu2 %2060 }
 0x441   :  { %v2219_v61 = vsub.f32 %v1995_v57, %v2071_v31  ;;  %3253 = vpow2.f32 %v2355_v8  ;;  %v2220_v21 = vsub.f32 %v1996_v56, %v2071_v31  ;;  %v2215_v51 = vsub.f32 %v1991_v37, %v2061_v18  ;;  %v5150_v31 = vld [vmem:[#allocation90_spill] sm:$0xff] }
 0x442   :  { %v2297_v50 = vmul.f32 1.442695, %v2223_v32  ;;  %v2299_v16 = vmul.f32 1.442695, %v2224_v14  ;;  %v2216_v8 = vsub.f32 %v1992_v5, %v2061_v18  ;;  %v1989_v56 = vmul.f32 %v4676_v35, %v5150_v31 }
 0x443   :  { %v2289_v12 = vmul.f32 1.442695, %v2219_v61  ;;  %v2291_v58 = vmul.f32 1.442695, %v2220_v21  ;;  %v2281_v53 = vmul.f32 1.442695, %v2215_v51  ;;  %v1990_v2 = vmul.f32 %v4679_v17, %v5150_v31 }
 0x444   :  { %v3248_v28 = vpop.eup %3247  ;;  %3255 = vpow2.f32 %v2297_v50  ;;  %v2283_v32 = vmul.f32 1.442695, %v2216_v8 }
 0x445   :  { %v3250_v4 = vpop.eup %3249  ;;  %3257 = vpow2.f32 %v2299_v16  ;;  %2462 = vmatpush.xpose.msra.mxu2 %v3248_v28 }
 0x446   :  { %2482 = vmatpush.xpose.msra.mxu3 %v3250_v4  ;;  %v3252_v59 = vpop.eup %3251  ;;  %3259 = vpow2.f32 %v2293_v19  ;;  %v2405_v19 = vrot.slane %v4766_v27, 5 }
 0x447   :  { %v2146_v24 = vpop.permute.xlu1 %2145  ;;  %v3254_v15 = vpop.eup %3253  ;;  %3261 = vpow2.f32 %v2295_v23  ;;  %v2406_v23 = vrot.slane %v4768_v43, 5 }
 0x448   :  { %v2249_v13 = vsub.f32 %v2025_v63, %v2146_v24  ;;  %v2250_v33 = vsub.f32 %v2026_v42, %v2146_v24  ;;  %v2136_v0 = vpop.permute.xlu0 %2135  ;;  %3263 = vpow2.f32 %v2289_v12  ;;  %v2409_v17 = vsel %vm1657_vm3, %v2405_v19, 1.0 }
 0x449   :  { %2463 = vmatpush.xpose.msra.mxu2 %v3252_v59  ;;  %v2245_v9 = vsub.f32 %v2021_v1, %v2136_v0  ;;  %3265 = vpow2.f32 %v2291_v58  ;;  %v2246_v29 = vsub.f32 %v2022_v54, %v2136_v0  ;;  %v2410_v12 = vsel %vm1657_vm3, %v2406_v23, 1.0 }
 0x44a   :  { %v3256_v55 = vpop.eup %3255  ;;  %v2349_v3 = vmul.f32 1.442695, %v2249_v13  ;;  %v2351_v62 = vmul.f32 1.442695, %v2250_v33  ;;  %2483 = vmatpush.xpose.msra.mxu3 %v3254_v15 }
 0x44b   :  { %v3258_v38 = vpop.eup %3257  ;;  %2421 = vmatpush.xpose.msra.mxu0 %v3256_v55  ;;  %v2341_v22 = vmul.f32 1.442695, %v2245_v9  ;;  %v2343_v46 = vmul.f32 1.442695, %v2246_v29 }
 0x44c   :  { %3267 = vpow2.f32 %v2349_v3  ;;  %2441 = vmatpush.xpose.msra.mxu1 %v3258_v38  ;;  %v3260_v30 = vpop.eup %3259 }
 0x44d   :  { %3269 = vpow2.f32 %v2351_v62  ;;  %v3262_v39 = vpop.eup %3261 }
 0x44e   :  { %v3264_v41 = vpop.eup %3263  ;;  %3271 = vpow2.f32 %v2345_v48 }
 0x44f   :  { %v2066_v40 = vpop.permute.xlu1 %2065  ;;  %2422 = vmatpush.xpose.msra.mxu0 %v3260_v30  ;;  %v3266_v6 = vpop.eup %3265  ;;  %3273 = vpow2.f32 %v2347_v11 }
 0x450   :  { %v2217_v7 = vsub.f32 %v1993_v36, %v2066_v40  ;;  %v2218_v45 = vsub.f32 %v1994_v47, %v2066_v40  ;;  %2442 = vmatpush.xpose.msra.mxu1 %v3262_v39  ;;  %3275 = vpow2.f32 %v2341_v22 }
 0x451   :  { %3277 = vpow2.f32 %v2343_v46 }
 0x452   :  { %v3268_v25 = vpop.eup %3267  ;;  %v2285_v52 = vmul.f32 1.442695, %v2217_v7  ;;  %v2287_v34 = vmul.f32 1.442695, %v2218_v45 }
 0x453   :  { %v3270_v57 = vpop.eup %3269  ;;  %2423 = vmatpush.xpose.msra.mxu0 %v3264_v41  ;;  %2464 = vmatpush.xpose.msra.mxu2 %v3268_v25 }
 0x454   :  { %3279 = vpow2.f32 %v2285_v52  ;;  %2443 = vmatpush.xpose.msra.mxu1 %v3266_v6  ;;  %2484 = vmatpush.xpose.msra.mxu3 %v3270_v57  ;;  %v3272_v14 = vpop.eup %3271 }
 0x455   :  { %3281 = vpow2.f32 %v2287_v34  ;;  %v3274_v50 = vpop.eup %3273 }
 0x456   :  { %v3276_v61 = vpop.eup %3275  ;;  %3283 = vpow2.f32 %v2281_v53 }
 0x457   :  { %v2056_v16 = vpop.permute.xlu1 %2055  ;;  %2465 = vmatpush.xpose.msra.mxu2 %v3272_v14  ;;  %v3278_v28 = vpop.eup %3277  ;;  %3285 = vpow2.f32 %v2283_v32 }
 0x458   :  { %v2213_v60 = vsub.f32 %v1989_v56, %v2056_v16  ;;  %v2214_v21 = vsub.f32 %v1990_v2, %v2056_v16  ;;  %2485 = vmatpush.xpose.msra.mxu3 %v3274_v50 }
 0x45a   :  { %v3280_v4 = vpop.eup %3279  ;;  %v2277_v10 = vmul.f32 1.442695, %v2213_v60  ;;  %v2279_v35 = vmul.f32 1.442695, %v2214_v21 }
 0x45b   :  { %v3282_v63 = vpop.eup %3281  ;;  %2424 = vmatpush.xpose.msra.mxu0 %v3280_v4  ;;  %2466 = vmatpush.xpose.msra.mxu2 %v3276_v61 }
 0x45c   :  { %3287 = vpow2.f32 %v2277_v10  ;;  %2444 = vmatpush.xpose.msra.mxu1 %v3282_v63  ;;  %2486 = vmatpush.xpose.msra.mxu3 %v3278_v28  ;;  %v3284_v42 = vpop.eup %3283 }
 0x45d   :  { %3289 = vpow2.f32 %v2279_v35  ;;  %v3286_v1 = vpop.eup %3285 }
 0x45e   :  { %2467 = vmatmul.f32.vlgmr.msra.gmra.mxu2 %v2409_v17 }
 0x45f   :  { %2487 = vmatmul.f32.vlgmr.msra.gmra.mxu3 %v2410_v12  ;;  %2425 = vmatpush.xpose.msra.mxu0 %v3284_v42 }
 0x460   :  { %2445 = vmatpush.xpose.msra.mxu1 %v3286_v1 }
 0x462   :  { %v3288_v27 = vpop.eup %3287 }
 0x463   :  { %v3290_v43 = vpop.eup %3289  ;;  %2426 = vmatpush.xpose.msra.mxu0 %v3288_v27 }
 0x464   :  { %2446 = vmatpush.xpose.msra.mxu1 %v3290_v43 }
 0x466   :  { %2427 = vmatmul.f32.vlgmr.msra.gmra.mxu0 %v2409_v17 }
 0x467   :  { %2447 = vmatmul.f32.vlgmr.msra.gmra.mxu1 %v2410_v12 }
 0x4a6   :  { %v1677_v24 = vpop.f32.mrf.mxu0 }
 0x4a7   :  { %v1697_v59 = vpop.f32.mrf.mxu1 }
 0x4a8   :  { %v1698_v13 = vadd.f32 %v1697_v59, %v1677_v24 }
 0x4ac   :  { %v1717_v49 = vpop.f32.mrf.mxu2 }
 0x4ad   :  { %v1737_v58 = vpop.f32.mrf.mxu3 }
 0x4ae   :  { %v1738_v20 = vadd.f32 %v1737_v58, %v1717_v49 }
 0x4b0   :  { %3291 = vrcp.f32 %v1738_v20 }
 0x4b1   :  { %3293 = vrcp.f32 %v1698_v13 }
 0x4b6   :  { %v3292_v3 = vpop.eup %3291 }
 0x4b7   :  { %v3294_v62 = vpop.eup %3293  ;;  %v1745_v38 = vrot.slane %v3292_v3, 1 }
 0x4b8   :  { %v1744_v11 = vrot.slane %v3294_v62, 1 }
 0x4b9   :  { %v1749_v26 = vmul.f32 %v1745_v38, %v1738_v20 }
 0x4ba   :  { %v1748_v47 = vmul.f32 %v1744_v11, %v1698_v13 }
 0x4e1   :  { %v2468_v33 = vpop.f32.mrf.mxu2 }
 0x4e2   :  { %v2488_v0 = vpop.f32.mrf.mxu3 }
 0x4e3   :  { %v2489_v15 = vadd.f32 %v2488_v0, %v2468_v33  ;;  %v2428_v54 = vpop.f32.mrf.mxu0 }
 0x4e4   :  { %v2448_v44 = vpop.f32.mrf.mxu1 }
 0x4e5   :  { %3295 = vrcp.f32 %v2489_v15  ;;  %v2449_v55 = vadd.f32 %v2448_v44, %v2428_v54 }
 0x4e7   :  { %3297 = vrcp.f32 %v2449_v55 }
 0x4eb   :  { %v3296_v9 = vpop.eup %3295 }
 0x4ec   :  { %v2496_v29 = vrot.slane %v3296_v9, 1 }
 0x4ed   :  { %v3298_v48 = vpop.eup %3297 }
 0x4ee   :  { %v2500_v18 = vmul.f32 %v2496_v29, %v2489_v15  ;;  %v2495_v30 = vrot.slane %v3298_v48, 1 }
 0x4f0   :  { %v2504_v37 = vrot.slane %v2500_v18, 7  ;;  %v2499_v36 = vmul.f32 %v2495_v30, %v2449_v55 }
 0x4f2   :  { %v2508_v22 = vsel %vm1657_vm3, %v1749_v26, %v2504_v37  ;;  %v2503_v39 = vrot.slane %v2499_v36, 7 }
 0x4f3   :  { %v2511_v5 = vrot.slane %v2508_v22, 6 }
 0x4f4   :  { %v2507_v46 = vsel %vm1657_vm3, %v1748_v47, %v2503_v39 }
 0x4f5   :  { %v2512_v40 = vsel %vm5151_vm4, %v2507_v46, %v2511_v5 }
 0x4f6   :  { %2514 = vst [vmem:[#allocation11] sm:$0xf] %v2512_v40 }
 0x4f7   :  { %2525 = dma.vmem_to_hbm [thread:$0]  %s2521_s4, 64, %s2523_s19, [#allocation4]  }
 0x4f8   :  { %3450 = dma.done.wait [#allocation4], 64  }
 0x4f9   :  { %3451 = vsyncadd [#allocation4], 4294967232 }
 0x4fa   :  { %2530 = vsyncpa [#allocation3], 1 }
 0x4fb   :  { %2531 = vsyncpa [#allocation6], 1 }
 0x4fc   :  { %2532 = vsyncpa [#allocation9], 1 }
 0x4fd   :  { %2533 = vsyncpa [#allocation4], 1 }

</bundles_post_ra>
